<compile_context>
chip_gen: v6e
topology: v6e:2x2x1
jax: 0.10.0
libtpu: 0.0.40
codegen_flags: <defaults>
</compile_context>

<pallas_src>
import functools

import jax
import jax.numpy as jnp
import numpy as np
from jax.experimental import pallas as pl
from jax.experimental.pallas import tpu as pltpu

LN_EPS = 1e-5        # nn.LayerNorm default / config.layer_norm_eps
NORM_EPS = 1e-12     # F.normalize default eps
LANE = 128
BF16_SUBLANE = 16

# packed per-modality row-operand layout (each row is a (1, width) vector)
ROW_ENC_G, ROW_ENC_BETA, ROW_ENC_MASK = 0, 1, 2
ROW_SKIP_B = 3
ROW_B1, ROW_G1, ROW_BETA1 = 4, 5, 6
ROW_B2, ROW_G2, ROW_BETA2 = 7, 8, 9
ROW_B3, ROW_G3, ROW_BETA3 = 10, 11, 12
ROW_LS = 13
ROW_ENC_BIAS0 = 14            # rows 14 .. 14+L-1 : per-layer encoder biases


def _round_up(n, m):
    return ((n + m - 1) // m) * m


def _vmem_capacity_bytes():
    try:
        return int(pltpu.get_tpu_info().vmem_capacity_bytes)
    except Exception:
        return 64 << 20          # conservative fallback (v7x per-core size)


# ---------------------------------------------------------------------------
# in-kernel helpers (f32 elementwise math; padded lanes stay exactly 0)
# ---------------------------------------------------------------------------
def _gelu_exact(x):
    # nn.GELU() default (approximate='none') uses erf.
    return 0.5 * x * (1.0 + jax.lax.erf(x * 0.7071067811865476))


def _ln_masked(x, g, b, mask_over_n):
    # mask_over_n = (lane < true_n) / true_n   (per-modality row operand)
    mu = jnp.sum(x * mask_over_n, axis=-1, keepdims=True)
    c = x - mu
    var = jnp.sum(c * c * mask_over_n, axis=-1, keepdims=True)
    # padded lanes: gamma/beta are zero-padded -> output stays exactly 0.
    return c * jax.lax.rsqrt(var + LN_EPS) * g + b


def _ln_static(x, g, b, true_n):
    # LayerNorm over a zero-padded lane axis with a *static* true width.
    n_pad = x.shape[-1]
    inv = 1.0 / float(true_n)
    mu = jnp.sum(x, axis=-1, keepdims=True) * inv        # padded lanes are 0
    c = x - mu
    if true_n != n_pad:
        lane = jax.lax.broadcasted_iota(jnp.int32, (1, n_pad), 1)
        c = jnp.where(lane < true_n, c, 0.0)
    var = jnp.sum(c * c, axis=-1, keepdims=True) * inv
    return c * jax.lax.rsqrt(var + LN_EPS) * g + b


# ---------------------------------------------------------------------------
# Kernel 1: fused dual tower (encoder + projection head + L2 normalize)
#   grid = (modality, batch_tile); weights resident (Buffered(1)) or streamed.
# ---------------------------------------------------------------------------
def _tower_kernel(x_ref, rows_ref, skip_w_ref, w1_ref, w2_ref, w3_ref,
                  enc_w_ref, out32_ref, out16_ref, *scratch,
                  num_layers, hid_true, p_true, stream):
    hpad = skip_w_ref.shape[0]
    hidpad = w1_ref.shape[1]
    ppad = skip_w_ref.shape[1]
    mm_dtype = w1_ref.dtype

    def row(i, width):
        return rows_ref[i:i + 1, :width]

    if stream:
        # enc_w_ref is the raw HBM (2, L, Hp, Hp) stack; manual double buffer.
        wbuf, sem = scratch
        m = pl.program_id(0)

        def layer_copy(l, slot):
            return pltpu.make_async_copy(enc_w_ref.at[m, l], wbuf.at[slot],
                                         sem.at[slot])

        layer_copy(0, 0).start()

    # --- CLIPEncoder: relu(Linear(x)) stack, then masked LayerNorm ----------
    h32 = x_ref[...].astype(jnp.float32)
    h_mm = x_ref[...]
    for l in range(num_layers):                           # static unrolled loop
        if stream:
            slot = l & 1
            layer_copy(l, slot).wait()
            if l + 1 < num_layers:
                layer_copy(l + 1, 1 - slot).start()
            w_l = wbuf[slot]
        else:
            w_l = enc_w_ref[l]
        z = (jnp.dot(h_mm, w_l, preferred_element_type=jnp.float32)
             + row(ROW_ENC_BIAS0 + l, hpad))
        h32 = jnp.maximum(z, 0.0)
        h_mm = h32.astype(mm_dtype)
    enc = _ln_masked(h32, row(ROW_ENC_G, hpad), row(ROW_ENC_BETA, hpad),
                     row(ROW_ENC_MASK, hpad))

    # --- OptimizedProjectionHead ---------------------------------------------
    # TODO(synk): nn.Dropout(p=0.1) (training-mode random mask) not modeled;
    # eval-mode identity is used here.
    enc_mm = enc.astype(mm_dtype)
    skip = (jnp.dot(enc_mm, skip_w_ref[...], preferred_element_type=jnp.float32)
            + row(ROW_SKIP_B, ppad))

    h = (jnp.dot(enc_mm, w1_ref[...], preferred_element_type=jnp.float32)
         + row(ROW_B1, hidpad))
    h = _gelu_exact(_ln_static(h, row(ROW_G1, hidpad), row(ROW_BETA1, hidpad),
                               hid_true))
    h = (jnp.dot(h.astype(mm_dtype), w2_ref[...],
                 preferred_element_type=jnp.float32) + row(ROW_B2, hidpad))
    h = _gelu_exact(_ln_static(h, row(ROW_G2, hidpad), row(ROW_BETA2, hidpad),
                               hid_true))
    h = (jnp.dot(h.astype(mm_dtype), w3_ref[...],
                 preferred_element_type=jnp.float32) + row(ROW_B3, ppad))
    h = _ln_static(h, row(ROW_G3, ppad), row(ROW_BETA3, ppad), p_true)

    emb = skip + row(ROW_LS, ppad) * h

    # --- F.normalize(dim=-1) --------------------------------------------------
    norm = jnp.sqrt(jnp.sum(emb * emb, axis=-1, keepdims=True))
    normed = emb / jnp.maximum(norm, NORM_EPS)
    out32_ref[...] = normed
    out16_ref[...] = normed.astype(out16_ref.dtype)


# ---------------------------------------------------------------------------
# Kernel 2: scaled similarity  d @ rhs.T * logit_scale   (NT dot, no HBM
# transpose; 2-D (row-tile, col-tile) parallel grid; scale in SMEM)
# ---------------------------------------------------------------------------
def _similarity_kernel(d_ref, r_ref, scale_ref, out_ref):
    acc = jax.lax.dot_general(d_ref[...], r_ref[...],
                              dimension_numbers=(((1,), (1,)), ((), ())),
                              preferred_element_type=jnp.float32)
    out_ref[...] = acc * scale_ref[0, 0]


def _pick_col_tile(cpad):
    for t in (512, 256, 128):
        if cpad % t == 0:
            return t
    return cpad


def _scaled_similarity(d16, rhs16, scale_11, tile_b, vmem_limit):
    bpad, ppad = d16.shape
    cpad = rhs16.shape[0]
    tile_c = _pick_col_tile(cpad)
    it = d16.dtype.itemsize
    cost = pl.CostEstimate(
        flops=int(2 * bpad * ppad * cpad),
        transcendentals=0,
        bytes_accessed=int(d16.size * it
                           + rhs16.size * it * max(1, bpad // tile_b)
                           + bpad * cpad * 4))
    return pl.pallas_call(
        _similarity_kernel,
        out_shape=jax.ShapeDtypeStruct((bpad, cpad), jnp.float32),
        grid=(bpad // tile_b, cpad // tile_c),
        in_specs=[pl.BlockSpec((tile_b, ppad), lambda i, j: (i, 0)),
                  pl.BlockSpec((tile_c, ppad), lambda i, j: (j, 0)),
                  pl.BlockSpec(memory_space=pltpu.MemorySpace.SMEM)],
        out_specs=pl.BlockSpec((tile_b, tile_c), lambda i, j: (i, j)),
        compiler_params=pltpu.CompilerParams(
            dimension_semantics=("parallel", "parallel"),
            vmem_limit_bytes=vmem_limit),
        cost_estimate=cost,
    )(d16, rhs16, scale_11)


# ---------------------------------------------------------------------------
# one-time parameter preparation (padding / bf16 cast / modality stacking)
# ---------------------------------------------------------------------------
def prepare_clip_params(params, *, matmul_dtype=jnp.bfloat16):
    # TODO(synk): on v7x the MXU takes fp8 natively; an e4m3 enc_w cast here
    # (gated behind an accuracy check) would halve weight DMA + VMEM further.
    td, tp = params["diffmap"], params["protein"]
    L = int(td["enc_w"].shape[0])
    assert int(tp["enc_w"].shape[0]) == L, "towers must share num_hidden_layers"
    Hd, Hp = int(td["enc_w"].shape[1]), int(tp["enc_w"].shape[1])
    P = int(td["skip_w"].shape[1])
    HID = int(td["w1"].shape[1])
    assert int(tp["skip_w"].shape[1]) == P and int(tp["w1"].shape[1]) == HID

    hpad = _round_up(max(Hd, Hp), LANE)
    ppad = _round_up(P, LANE)
    hidpad = _round_up(HID, LANE)
    maxpad = max(hpad, hidpad, ppad)
    n_rows = ROW_ENC_BIAS0 + L

    def pad_w(w, rows, cols):
        return jnp.pad(w, ((0, rows - w.shape[0]),
                           (0, cols - w.shape[1]))).astype(matmul_dtype)

    def row(v):
        v = jnp.asarray(v, jnp.float32).reshape(1, -1)
        return jnp.pad(v, ((0, 0), (0, maxpad - v.shape[1])))

    def tower_arrays(t, layer_scale, h_true):
        mask = (jnp.arange(hpad) < h_true).astype(jnp.float32) / float(h_true)
        ls_row = jnp.broadcast_to(
            jnp.asarray(layer_scale, jnp.float32).reshape(1, 1), (1, ppad))
        rows = [row(t["enc_g"]), row(t["enc_beta"]), row(mask),
                row(t["skip_b"]),
                row(t["b1"]), row(t["g1"]), row(t["beta1"]),
                row(t["b2"]), row(t["g2"]), row(t["beta2"]),
                row(t["b3"]), row(t["g3"]), row(t["beta3"]),
                row(ls_row)]
        rows += [row(t["enc_b"][l]) for l in range(L)]
        return dict(
            rows=jnp.concatenate(rows, axis=0),
            enc_w=jnp.pad(t["enc_w"],
                          ((0, 0), (0, hpad - t["enc_w"].shape[1]),
                           (0, hpad - t["enc_w"].shape[2]))).astype(matmul_dtype),
            skip_w=pad_w(t["skip_w"], hpad, ppad),
            w1=pad_w(t["w1"], hpad, hidpad),
            w2=pad_w(t["w2"], hidpad, hidpad),
            w3=pad_w(t["w3"], hidpad, ppad),
        )

    ad = tower_arrays(td, params["layer_scale_d"], Hd)
    ap = tower_arrays(tp, params["layer_scale_p"], Hp)
    arrays = {k: jnp.stack([ad[k], ap[k]], axis=0)
              for k in ("rows", "skip_w", "w1", "w2", "w3", "enc_w")}
    meta = dict(L=L, Hd=Hd, Hp=Hp, P=P, HID=HID,
                hpad=hpad, hidpad=hidpad, ppad=ppad, maxpad=maxpad,
                n_rows=n_rows, mm_dtype=matmul_dtype)
    return dict(arrays=arrays, meta=meta)


# ---------------------------------------------------------------------------
# tower pallas_call wrapper
# ---------------------------------------------------------------------------
def _const_spec(tail, buffer_count=1):
    nd = len(tail)
    return pl.BlockSpec((None,) + tuple(tail),
                        lambda m, i, nd=nd: (m,) + (0,) * nd,
                        pipeline_mode=pl.Buffered(buffer_count))


def _tower_vmem_bytes(tile_b, meta, stream):
    it = np.dtype(meta["mm_dtype"]).itemsize
    hpad, hidpad, ppad = meta["hpad"], meta["hidpad"], meta["ppad"]
    w = (hpad * ppad + hpad * hidpad + hidpad * hidpad + hidpad * ppad) * it
    w += (2 * hpad * hpad * it) if stream else (meta["L"] * hpad * hpad * it)
    w += _round_up(meta["n_rows"], 8) * meta["maxpad"] * 4
    io = 2 * tile_b * hpad * it + 2 * tile_b * ppad * (4 + it)   # x/out, 2-deep
    act = 2 * tile_b * (2 * hpad + 2 * hidpad + 3 * ppad) * 4    # f32 temporaries
    return w + io + act


def _encode_project_towers(xd, xp, prepared, *, batch_tile=None,
                           force_stream_encoder=None):
    meta, arrs = prepared["meta"], prepared["arrays"]
    mm_dtype = meta["mm_dtype"]
    B, Hd = xd.shape
    Bp, Hp = xp.shape
    assert Bp == B and Hd == meta["Hd"] and Hp == meta["Hp"]
    hpad, hidpad, ppad = meta["hpad"], meta["hidpad"], meta["ppad"]
    L = meta["L"]

    cap = _vmem_capacity_bytes()
    usable = int(cap * 0.85)
    if batch_tile is None:
        batch_tile = 256 if usable >= (96 << 20) else 128
    tile_b = max(BF16_SUBLANE, min(_round_up(batch_tile, BF16_SUBLANE),
                                   _round_up(B, BF16_SUBLANE)))
    bpad = _round_up(B, tile_b)

    if force_stream_encoder is None:
        stream = _tower_vmem_bytes(tile_b, meta, stream=False) + (8 << 20) > usable
    else:
        stream = bool(force_stream_encoder)
    # TODO(synk): if even the streamed footprint exceeds `usable`, shrink tile_b
    # (or tile the hidden dim) instead of relying on a compile-time rejection.

    x = jnp.stack([
        jnp.pad(xd, ((0, bpad - B), (0, hpad - Hd))),
        jnp.pad(xp, ((0, bpad - B), (0, hpad - Hp))),
    ], axis=0).astype(mm_dtype)                            # (2, Bpad, Hpad)

    in_specs = [pl.BlockSpec((None, tile_b, hpad), lambda m, i: (m, i, 0)),
                _const_spec((meta["n_rows"], meta["maxpad"])),
                _const_spec((hpad, ppad)),
                _const_spec((hpad, hidpad)),
                _const_spec((hidpad, hidpad)),
                _const_spec((hidpad, ppad))]
    if stream:
        in_specs.append(pl.BlockSpec(memory_space=pl.ANY))
        scratch_shapes = [pltpu.VMEM((2, hpad, hpad), mm_dtype),
                          pltpu.SemaphoreType.DMA((2,))]
    else:
        in_specs.append(_const_spec((L, hpad, hpad)))
        scratch_shapes = []

    out_shape = (jax.ShapeDtypeStruct((2, bpad, ppad), jnp.float32),
                 jax.ShapeDtypeStruct((2, bpad, ppad), mm_dtype))
    out_specs = [pl.BlockSpec((None, tile_b, ppad), lambda m, i: (m, i, 0)),
                 pl.BlockSpec((None, tile_b, ppad), lambda m, i: (m, i, 0))]

    it = np.dtype(mm_dtype).itemsize
    mm_cols = (L * hpad * hpad + hpad * ppad + hpad * hidpad
               + hidpad * hidpad + hidpad * ppad)
    weight_bytes = sum(int(np.prod(arrs[k].shape)) * arrs[k].dtype.itemsize
                       for k in ("rows", "skip_w", "w1", "w2", "w3", "enc_w"))
    cost = pl.CostEstimate(
        flops=int(2 * 2 * bpad * mm_cols),
        transcendentals=int(2 * bpad * 2 * hidpad),
        bytes_accessed=int(x.size * it + weight_bytes + 2 * bpad * ppad * (4 + it)))

    kernel = functools.partial(_tower_kernel, num_layers=L,
                               hid_true=meta["HID"], p_true=meta["P"],
                               stream=stream)
    emb32, emb16 = pl.pallas_call(
        kernel,
        out_shape=out_shape,
        grid=(2, bpad // tile_b),
        in_specs=in_specs,
        out_specs=out_specs,
        scratch_shapes=scratch_shapes,
        compiler_params=pltpu.CompilerParams(
            dimension_semantics=("parallel", "parallel"),
            vmem_limit_bytes=usable),
        cost_estimate=cost,
    )(x, arrs["rows"], arrs["skip_w"], arrs["w1"], arrs["w2"], arrs["w3"],
      arrs["enc_w"])
    return emb32, emb16, tile_b, usable


# ---------------------------------------------------------------------------
# full forward pass (single-device; distributed all_gather branch skipped)
# ---------------------------------------------------------------------------
def optimized_clip_forward(diffmap_values, protein_values, prepared,
                           logit_scale_param, cache_size=None, *,
                           cache=None, cache_ptr=0,
                           batch_tile=None, force_stream_encoder=None):
    meta = prepared["meta"]
    P = meta["P"]
    B = diffmap_values.shape[0]

    emb32, emb16, tile_b, vmem_limit = _encode_project_towers(
        diffmap_values, protein_values, prepared,
        batch_tile=batch_tile, force_stream_encoder=force_stream_encoder)

    diffmap_embeds = emb32[0, :B, :P]
    protein_embeds = emb32[1, :B, :P]
    d16 = emb16[0]                                         # (Bpad, Ppad) bf16
    p16 = emb16[1]

    logit_scale = jnp.minimum(
        jnp.exp(jnp.asarray(logit_scale_param, jnp.float32)), 100.0)
    scale_11 = jnp.reshape(logit_scale, (1, 1))

    sim = _scaled_similarity(d16, p16, scale_11, tile_b, vmem_limit)
    logits_per_diffmap_protein = sim[:B, :B]

    out = {
        "logits_per_diffmap_protein": logits_per_diffmap_protein,
        "diffmap_embeds": diffmap_embeds,
        "protein_embeds": protein_embeds,
    }

    if cache is None:
        # Fresh module: update_cache writes cache[:B] = protein_embeds and sets
        # ptr = B, so cache[:ptr] == protein_embeds and the cache logits equal
        # the protein logits.  Reuse them instead of repeating the BxBxP matmul.
        if cache_size is not None:
            assert B <= cache_size, "batch must fit in the protein embedding cache"
        out["logits_per_diffmap_cache"] = logits_per_diffmap_protein
    else:
        # Warm (stateful) cache: real update_cache + d @ cache[:ptr].T path.
        csize = cache.shape[0]
        ptr = int(cache_ptr)
        if ptr + B > csize:
            ptr = 0
        new_cache = jax.lax.dynamic_update_slice(
            cache.astype(jnp.float32), jax.lax.stop_gradient(protein_embeds),
            (ptr, 0))
        new_ptr = (ptr + B) % csize
        if new_ptr == 0:
            out["logits_per_diffmap_cache"] = jnp.zeros((B, 0), jnp.float32)
        else:
            crows = _round_up(new_ptr, LANE)
            rhs = jnp.zeros((crows, meta["ppad"]), meta["mm_dtype"])
            rhs = rhs.at[:new_ptr, :P].set(
                new_cache[:new_ptr].astype(meta["mm_dtype"]))
            sim_c = _scaled_similarity(d16, rhs, scale_11, tile_b, vmem_limit)
            out["logits_per_diffmap_cache"] = sim_c[:B, :new_ptr]
        out["updated_cache"] = new_cache
        out["updated_cache_ptr"] = new_ptr

    return out


# ---------------------------------------------------------------------------
# deterministic parameter construction (synthetic, PyTorch-like uniform init)
# ---------------------------------------------------------------------------
def _init_linear(key, fan_in, fan_out):
    kw, kb = jax.random.split(key)
    bound = 1.0 / np.sqrt(fan_in)
    w = jax.random.uniform(kw, (fan_in, fan_out), jnp.float32, -bound, bound)
    b = jax.random.uniform(kb, (1, fan_out), jnp.float32, -bound, bound)
    return w, b


def init_tower(key, hidden, num_layers, proj_dim):
    hid = proj_dim * 4
    keys = jax.random.split(key, num_layers + 4)
    enc_w, enc_b = [], []
    for l in range(num_layers):
        w, b = _init_linear(keys[l], hidden, hidden)
        enc_w.append(w)
        enc_b.append(b)
    skip_w, skip_b = _init_linear(keys[num_layers], hidden, proj_dim)
    w1, b1 = _init_linear(keys[num_layers + 1], hidden, hid)
    w2, b2 = _init_linear(keys[num_layers + 2], hid, hid)
    w3, b3 = _init_linear(keys[num_layers + 3], hid, proj_dim)
    return {
        "enc_w": jnp.stack(enc_w), "enc_b": jnp.stack(enc_b),
        "enc_g": jnp.ones((1, hidden), jnp.float32),
        "enc_beta": jnp.zeros((1, hidden), jnp.float32),
        "skip_w": skip_w, "skip_b": skip_b,
        "w1": w1, "b1": b1,
        "g1": jnp.ones((1, hid), jnp.float32), "beta1": jnp.zeros((1, hid), jnp.float32),
        "w2": w2, "b2": b2,
        "g2": jnp.ones((1, hid), jnp.float32), "beta2": jnp.zeros((1, hid), jnp.float32),
        "w3": w3, "b3": b3,
        "g3": jnp.ones((1, proj_dim), jnp.float32),
        "beta3": jnp.zeros((1, proj_dim), jnp.float32),
    }


# ---------------------------------------------------------------------------
# pure-JAX reference (same math, same bf16 matmul casts) for correctness check
# ---------------------------------------------------------------------------
def _ln_ref(x, g, b):
    mu = jnp.mean(x, axis=-1, keepdims=True)
    var = jnp.mean((x - mu) ** 2, axis=-1, keepdims=True)
    return (x - mu) * jax.lax.rsqrt(var + LN_EPS) * g + b


def _ref_tower(x, t, layer_scale, mm_dtype):
    h32 = x.astype(jnp.float32)
    for l in range(t["enc_w"].shape[0]):
        z = jnp.dot(h32.astype(mm_dtype), t["enc_w"][l].astype(mm_dtype),
                    preferred_element_type=jnp.float32) + t["enc_b"][l]
        h32 = jnp.maximum(z, 0.0)
    enc = _ln_ref(h32, t["enc_g"], t["enc_beta"])
    enc_mm = enc.astype(mm_dtype)

    def mm(a, w):
        return jnp.dot(a, w.astype(mm_dtype), preferred_element_type=jnp.float32)

    skip = mm(enc_mm, t["skip_w"]) + t["skip_b"]
    h = _gelu_exact(_ln_ref(mm(enc_mm, t["w1"]) + t["b1"], t["g1"], t["beta1"]))
    h = _gelu_exact(_ln_ref(mm(h.astype(mm_dtype), t["w2"]) + t["b2"],
                            t["g2"], t["beta2"]))
    h = _ln_ref(mm(h.astype(mm_dtype), t["w3"]) + t["b3"], t["g3"], t["beta3"])
    emb = skip + layer_scale.reshape(1, 1) * h
    n = jnp.sqrt(jnp.sum(emb * emb, axis=-1, keepdims=True))
    return emb / jnp.maximum(n, NORM_EPS)


def reference_forward(xd, xp, params, cache_size, mm_dtype=jnp.bfloat16,
                      cache=None, cache_ptr=0):
    d = _ref_tower(xd, params["diffmap"], params["layer_scale_d"], mm_dtype)
    p = _ref_tower(xp, params["protein"], params["layer_scale_p"], mm_dtype)
    B, P = p.shape
    if cache is None:
        cache = jnp.zeros((cache_size, P), jnp.float32)
        ptr = 0
    else:
        cache = cache.astype(jnp.float32)
        ptr = int(cache_ptr)
    if ptr + B > cache_size:
        ptr = 0
    cache = cache.at[ptr:ptr + B].set(jax.lax.stop_gradient(p))
    new_ptr = (ptr + B) % cache_size
    scale = jnp.minimum(jnp.exp(params["logit_scale"]), 100.0)
    sim_dp = jnp.dot(d.astype(mm_dtype), p.astype(mm_dtype).T,
                     preferred_element_type=jnp.float32) * scale
    if new_ptr == 0:
        sim_dc = jnp.zeros((B, 0), jnp.float32)
    else:
        sim_dc = jnp.dot(d.astype(mm_dtype), cache[:new_ptr].astype(mm_dtype).T,
                         preferred_element_type=jnp.float32) * scale
    return {
        "logits_per_diffmap_protein": sim_dp,
        "logits_per_diffmap_cache": sim_dc,
        "diffmap_embeds": d,
        "protein_embeds": p,
    }


if __name__ == "__main__":
    # small config consistent with the module
    B = 8            # batch
    H_DIFF = 32      # diffmap_config.hidden_size
    H_PROT = 32      # protein_config.hidden_size
    PROJ = 16        # projection_dim  (head hidden_dim = 4 * PROJ = 64)
    N_LAYERS = 2     # num_hidden_layers
    CACHE = 64       # cache_size

    key = jax.random.PRNGKey(0)
    k_d, k_p, k_xd, k_xp, k_c = jax.random.split(key, 5)

    params = {
        "diffmap": init_tower(k_d, H_DIFF, N_LAYERS, PROJ),
        "protein": init_tower(k_p, H_PROT, N_LAYERS, PROJ),
        "layer_scale_d": jnp.full((1,), 1e-4, jnp.float32),
        "layer_scale_p": jnp.full((1,), 1e-4, jnp.float32),
        "logit_scale": jnp.array(np.log(1.0 / 0.07), jnp.float32),
    }

    diffmap_values = jax.random.normal(k_xd, (B, H_DIFF), jnp.float32)
    protein_values = jax.random.normal(k_xp, (B, H_PROT), jnp.float32)

    # one-time padding / bf16 cast / stacking of the weights
    prepared = prepare_clip_params(params)

    tol = {"diffmap_embeds": 2e-3, "protein_embeds": 2e-3,
           "logits_per_diffmap_protein": 2e-2, "logits_per_diffmap_cache": 2e-2}

    ref = reference_forward(diffmap_values, protein_values, params, CACHE)

    # 1) fresh-cache forward, VMEM-resident encoder weights
    out = optimized_clip_forward(diffmap_values, protein_values, prepared,
                                 params["logit_scale"], CACHE)
    out = jax.block_until_ready(out)
    for name in tol:
        np.testing.assert_allclose(np.asarray(out[name]), np.asarray(ref[name]),
                                   rtol=tol[name], atol=tol[name])

    # 2) forced encoder-weight streaming path (HBM -> VMEM manual double buffer)
    out_s = optimized_clip_forward(diffmap_values, protein_values, prepared,
                                   params["logit_scale"], CACHE,
                                   force_stream_encoder=True)
    out_s = jax.block_until_ready(out_s)
    for name in tol:
        np.testing.assert_allclose(np.asarray(out_s[name]), np.asarray(ref[name]),
                                   rtol=tol[name], atol=tol[name])

    # 3) warm (stateful) cache path
    warm_cache = jax.random.normal(k_c, (CACHE, PROJ), jnp.float32) * 0.1
    out_w = optimized_clip_forward(diffmap_values, protein_values, prepared,
                                   params["logit_scale"], CACHE,
                                   cache=warm_cache, cache_ptr=5)
    jax.block_until_ready(out_w["logits_per_diffmap_cache"])
    ref_w = reference_forward(diffmap_values, protein_values, params, CACHE,
                              cache=warm_cache, cache_ptr=5)
    np.testing.assert_allclose(np.asarray(out_w["logits_per_diffmap_cache"]),
                               np.asarray(ref_w["logits_per_diffmap_cache"]),
                               rtol=2e-2, atol=2e-2)

    print("KERNEL_OK")
</pallas_src>

<mosaic_0001>
module attributes {stable_mosaic.version = 11 : i64} {
  func.func @_tower_kernel(%arg0: i32, %arg1: i32, %arg2: memref<1x16x128xbf16, #tpu.memory_space<vmem>>, %arg3: memref<1x16x128xf32, #tpu.memory_space<vmem>>, %arg4: memref<1x128x128xbf16, #tpu.memory_space<vmem>>, %arg5: memref<1x128x128xbf16, #tpu.memory_space<vmem>>, %arg6: memref<1x128x128xbf16, #tpu.memory_space<vmem>>, %arg7: memref<1x128x128xbf16, #tpu.memory_space<vmem>>, %arg8: memref<1x2x128x128xbf16, #tpu.memory_space<vmem>>, %arg9: memref<1x16x128xf32, #tpu.memory_space<vmem>>, %arg10: memref<1x16x128xbf16, #tpu.memory_space<vmem>>) attributes {dimension_semantics = [#tpu.dimension_semantics<parallel>, #tpu.dimension_semantics<parallel>], iteration_bounds = array<i64: 2, 1>, scalar_prefetch = 0 : i64, scratch_operands = 0 : i64, tpu.core_type = #tpu.core_type<tc>, window_params = [{transform_indices = @transform_0, window_bounds = array<i64: 1, 16, 128>}, {pipeline_mode = #tpu.pipeline_mode<synchronous>, transform_indices = @transform_1, window_bounds = array<i64: 1, 16, 128>}, {pipeline_mode = #tpu.pipeline_mode<synchronous>, transform_indices = @transform_2, window_bounds = array<i64: 1, 128, 128>}, {pipeline_mode = #tpu.pipeline_mode<synchronous>, transform_indices = @transform_3, window_bounds = array<i64: 1, 128, 128>}, {pipeline_mode = #tpu.pipeline_mode<synchronous>, transform_indices = @transform_4, window_bounds = array<i64: 1, 128, 128>}, {pipeline_mode = #tpu.pipeline_mode<synchronous>, transform_indices = @transform_5, window_bounds = array<i64: 1, 128, 128>}, {pipeline_mode = #tpu.pipeline_mode<synchronous>, transform_indices = @transform_6, window_bounds = array<i64: 1, 2, 128, 128>}, {transform_indices = @transform_7, window_bounds = array<i64: 1, 16, 128>}, {transform_indices = @transform_8, window_bounds = array<i64: 1, 16, 128>}]} {
    %c0 = arith.constant 0 : index
    %c0_0 = arith.constant 0 : index
    %c0_1 = arith.constant 0 : index
    %0 = vector.load %arg2[%c0, %c0_0, %c0_1] : memref<1x16x128xbf16, #tpu.memory_space<vmem>>, vector<1x16x128xbf16>
    %1 = vector.shape_cast %0 : vector<1x16x128xbf16> to vector<16x128xbf16>
    %c0_2 = arith.constant 0 : index
    %c0_3 = arith.constant 0 : index
    %c0_4 = arith.constant 0 : index
    %c0_5 = arith.constant 0 : index
    %2 = vector.load %arg8[%c0_2, %c0_3, %c0_4, %c0_5] : memref<1x2x128x128xbf16, #tpu.memory_space<vmem>>, vector<1x1x128x128xbf16>
    %3 = vector.shape_cast %2 : vector<1x1x128x128xbf16> to vector<128x128xbf16>
    %cst = arith.constant dense<0.000000e+00> : vector<16x128xf32>
    %4 = tpu.matmul %1, %3, %cst {dimension_numbers = #tpu.dot_dimension_numbers<[1], [0], [0], [1], [0, 0, 1, 1], [], []>} : vector<16x128xbf16>, vector<128x128xbf16>, vector<16x128xf32> -> vector<16x128xf32>
    %c0_6 = arith.constant 0 : index
    %c14 = arith.constant 14 : index
    %c0_7 = arith.constant 0 : index
    %5 = vector.load %arg3[%c0_6, %c14, %c0_7] : memref<1x16x128xf32, #tpu.memory_space<vmem>>, vector<1x1x128xf32>
    %6 = vector.shape_cast %5 : vector<1x1x128xf32> to vector<1x128xf32>
    %7 = vector.broadcast %6 : vector<1x128xf32> to vector<16x128xf32>
    %8 = arith.addf %4, %7 : vector<16x128xf32>
    %cst_8 = arith.constant 0.000000e+00 : f32
    %9 = vector.broadcast %cst_8 : f32 to vector<16x128xf32>
    %10 = arith.maximumf %8, %9 : vector<16x128xf32>
    %11 = arith.truncf %10 : vector<16x128xf32> to vector<16x128xbf16>
    %c0_9 = arith.constant 0 : index
    %c1 = arith.constant 1 : index
    %c0_10 = arith.constant 0 : index
    %c0_11 = arith.constant 0 : index
    %12 = vector.load %arg8[%c0_9, %c1, %c0_10, %c0_11] : memref<1x2x128x128xbf16, #tpu.memory_space<vmem>>, vector<1x1x128x128xbf16>
    %13 = vector.shape_cast %12 : vector<1x1x128x128xbf16> to vector<128x128xbf16>
    %cst_12 = arith.constant dense<0.000000e+00> : vector<16x128xf32>
    %14 = tpu.matmul %11, %13, %cst_12 {dimension_numbers = #tpu.dot_dimension_numbers<[1], [0], [0], [1], [0, 0, 1, 1], [], []>} : vector<16x128xbf16>, vector<128x128xbf16>, vector<16x128xf32> -> vector<16x128xf32>
    %c0_13 = arith.constant 0 : index
    %c15 = arith.constant 15 : index
    %c0_14 = arith.constant 0 : index
    %15 = vector.load %arg3[%c0_13, %c15, %c0_14] : memref<1x16x128xf32, #tpu.memory_space<vmem>>, vector<1x1x128xf32>
    %16 = vector.shape_cast %15 : vector<1x1x128xf32> to vector<1x128xf32>
    %17 = vector.broadcast %16 : vector<1x128xf32> to vector<16x128xf32>
    %18 = arith.addf %14, %17 : vector<16x128xf32>
    %cst_15 = arith.constant 0.000000e+00 : f32
    %19 = vector.broadcast %cst_15 : f32 to vector<16x128xf32>
    %20 = arith.maximumf %18, %19 : vector<16x128xf32>
    %c0_16 = arith.constant 0 : index
    %c0_17 = arith.constant 0 : index
    %c0_18 = arith.constant 0 : index
    %21 = vector.load %arg3[%c0_16, %c0_17, %c0_18] : memref<1x16x128xf32, #tpu.memory_space<vmem>>, vector<1x1x128xf32>
    %22 = vector.shape_cast %21 : vector<1x1x128xf32> to vector<1x128xf32>
    %c0_19 = arith.constant 0 : index
    %c1_20 = arith.constant 1 : index
    %c0_21 = arith.constant 0 : index
    %23 = vector.load %arg3[%c0_19, %c1_20, %c0_21] : memref<1x16x128xf32, #tpu.memory_space<vmem>>, vector<1x1x128xf32>
    %24 = vector.shape_cast %23 : vector<1x1x128xf32> to vector<1x128xf32>
    %c0_22 = arith.constant 0 : index
    %c2 = arith.constant 2 : index
    %c0_23 = arith.constant 0 : index
    %25 = vector.load %arg3[%c0_22, %c2, %c0_23] : memref<1x16x128xf32, #tpu.memory_space<vmem>>, vector<1x1x128xf32>
    %26 = vector.shape_cast %25 : vector<1x1x128xf32> to vector<1x128xf32>
    %27 = vector.broadcast %26 : vector<1x128xf32> to vector<16x128xf32>
    %28 = arith.mulf %20, %27 : vector<16x128xf32>
    %cst_24 = arith.constant dense<0.000000e+00> : vector<16xf32>
    %29 = vector.multi_reduction <add>, %28, %cst_24 [1] : vector<16x128xf32> to vector<16xf32>
    %30 = vector.shape_cast %29 : vector<16xf32> to vector<16x1xf32>
    %31 = vector.broadcast %30 : vector<16x1xf32> to vector<16x128xf32>
    %32 = arith.subf %20, %31 : vector<16x128xf32>
    %33 = arith.mulf %32, %32 : vector<16x128xf32>
    %34 = vector.broadcast %26 : vector<1x128xf32> to vector<16x128xf32>
    %35 = arith.mulf %33, %34 : vector<16x128xf32>
    %cst_25 = arith.constant dense<0.000000e+00> : vector<16xf32>
    %36 = vector.multi_reduction <add>, %35, %cst_25 [1] : vector<16x128xf32> to vector<16xf32>
    %37 = vector.shape_cast %36 : vector<16xf32> to vector<16x1xf32>
    %cst_26 = arith.constant 9.99999974E-6 : f32
    %38 = vector.broadcast %cst_26 : f32 to vector<16x1xf32>
    %39 = arith.addf %37, %38 : vector<16x1xf32>
    %40 = math.rsqrt %39 : vector<16x1xf32>
    %41 = vector.broadcast %40 : vector<16x1xf32> to vector<16x128xf32>
    %42 = arith.mulf %32, %41 : vector<16x128xf32>
    %43 = vector.broadcast %22 : vector<1x128xf32> to vector<16x128xf32>
    %44 = arith.mulf %42, %43 : vector<16x128xf32>
    %45 = vector.broadcast %24 : vector<1x128xf32> to vector<16x128xf32>
    %46 = arith.addf %44, %45 : vector<16x128xf32>
    %47 = arith.truncf %46 : vector<16x128xf32> to vector<16x128xbf16>
    %c0_27 = arith.constant 0 : index
    %c0_28 = arith.constant 0 : index
    %c0_29 = arith.constant 0 : index
    %48 = vector.load %arg4[%c0_27, %c0_28, %c0_29] : memref<1x128x128xbf16, #tpu.memory_space<vmem>>, vector<1x128x128xbf16>
    %49 = vector.shape_cast %48 : vector<1x128x128xbf16> to vector<128x128xbf16>
    %cst_30 = arith.constant dense<0.000000e+00> : vector<16x128xf32>
    %50 = tpu.matmul %47, %49, %cst_30 {dimension_numbers = #tpu.dot_dimension_numbers<[1], [0], [0], [1], [0, 0, 1, 1], [], []>} : vector<16x128xbf16>, vector<128x128xbf16>, vector<16x128xf32> -> vector<16x128xf32>
    %c0_31 = arith.constant 0 : index
    %c3 = arith.constant 3 : index
    %c0_32 = arith.constant 0 : index
    %51 = vector.load %arg3[%c0_31, %c3, %c0_32] : memref<1x16x128xf32, #tpu.memory_space<vmem>>, vector<1x1x128xf32>
    %52 = vector.shape_cast %51 : vector<1x1x128xf32> to vector<1x128xf32>
    %53 = vector.broadcast %52 : vector<1x128xf32> to vector<16x128xf32>
    %54 = arith.addf %50, %53 : vector<16x128xf32>
    %c0_33 = arith.constant 0 : index
    %c0_34 = arith.constant 0 : index
    %c0_35 = arith.constant 0 : index
    %55 = vector.load %arg5[%c0_33, %c0_34, %c0_35] : memref<1x128x128xbf16, #tpu.memory_space<vmem>>, vector<1x128x128xbf16>
    %56 = vector.shape_cast %55 : vector<1x128x128xbf16> to vector<128x128xbf16>
    %cst_36 = arith.constant dense<0.000000e+00> : vector<16x128xf32>
    %57 = tpu.matmul %47, %56, %cst_36 {dimension_numbers = #tpu.dot_dimension_numbers<[1], [0], [0], [1], [0, 0, 1, 1], [], []>} : vector<16x128xbf16>, vector<128x128xbf16>, vector<16x128xf32> -> vector<16x128xf32>
    %c0_37 = arith.constant 0 : index
    %c4 = arith.constant 4 : index
    %c0_38 = arith.constant 0 : index
    %58 = vector.load %arg3[%c0_37, %c4, %c0_38] : memref<1x16x128xf32, #tpu.memory_space<vmem>>, vector<1x1x128xf32>
    %59 = vector.shape_cast %58 : vector<1x1x128xf32> to vector<1x128xf32>
    %60 = vector.broadcast %59 : vector<1x128xf32> to vector<16x128xf32>
    %61 = arith.addf %57, %60 : vector<16x128xf32>
    %c0_39 = arith.constant 0 : index
    %c5 = arith.constant 5 : index
    %c0_40 = arith.constant 0 : index
    %62 = vector.load %arg3[%c0_39, %c5, %c0_40] : memref<1x16x128xf32, #tpu.memory_space<vmem>>, vector<1x1x128xf32>
    %63 = vector.shape_cast %62 : vector<1x1x128xf32> to vector<1x128xf32>
    %c0_41 = arith.constant 0 : index
    %c6 = arith.constant 6 : index
    %c0_42 = arith.constant 0 : index
    %64 = vector.load %arg3[%c0_41, %c6, %c0_42] : memref<1x16x128xf32, #tpu.memory_space<vmem>>, vector<1x1x128xf32>
    %65 = vector.shape_cast %64 : vector<1x1x128xf32> to vector<1x128xf32>
    %cst_43 = arith.constant dense<0.000000e+00> : vector<16xf32>
    %66 = vector.multi_reduction <add>, %61, %cst_43 [1] : vector<16x128xf32> to vector<16xf32>
    %67 = vector.shape_cast %66 : vector<16xf32> to vector<16x1xf32>
    %cst_44 = arith.constant 1.562500e-02 : f32
    %68 = vector.broadcast %cst_44 : f32 to vector<16x1xf32>
    %69 = arith.mulf %67, %68 : vector<16x1xf32>
    %70 = vector.broadcast %69 : vector<16x1xf32> to vector<16x128xf32>
    %71 = arith.subf %61, %70 : vector<16x128xf32>
    %72 = tpu.iota {dimensions = array<i32: 1>} : vector<1x128xi32>
    %c64_i32 = arith.constant 64 : i32
    %73 = vector.broadcast %c64_i32 : i32 to vector<1x128xi32>
    %74 = arith.cmpi slt, %72, %73 : vector<1x128xi32>
    %cst_45 = arith.constant 0.000000e+00 : f32
    %75 = vector.shape_cast %74 : vector<1x128xi1> to vector<1x128xi1>
    %76 = vector.broadcast %75 : vector<1x128xi1> to vector<16x128xi1>
    %77 = vector.broadcast %cst_45 : f32 to vector<16x128xf32>
    %78 = arith.select %76, %71, %77 : vector<16x128xi1>, vector<16x128xf32>
    %79 = arith.mulf %78, %78 : vector<16x128xf32>
    %cst_46 = arith.constant dense<0.000000e+00> : vector<16xf32>
    %80 = vector.multi_reduction <add>, %79, %cst_46 [1] : vector<16x128xf32> to vector<16xf32>
    %81 = vector.shape_cast %80 : vector<16xf32> to vector<16x1xf32>
    %cst_47 = arith.constant 1.562500e-02 : f32
    %82 = vector.broadcast %cst_47 : f32 to vector<16x1xf32>
    %83 = arith.mulf %81, %82 : vector<16x1xf32>
    %cst_48 = arith.constant 9.99999974E-6 : f32
    %84 = vector.broadcast %cst_48 : f32 to vector<16x1xf32>
    %85 = arith.addf %83, %84 : vector<16x1xf32>
    %86 = math.rsqrt %85 : vector<16x1xf32>
    %87 = vector.broadcast %86 : vector<16x1xf32> to vector<16x128xf32>
    %88 = arith.mulf %78, %87 : vector<16x128xf32>
    %89 = vector.broadcast %63 : vector<1x128xf32> to vector<16x128xf32>
    %90 = arith.mulf %88, %89 : vector<16x128xf32>
    %91 = vector.broadcast %65 : vector<1x128xf32> to vector<16x128xf32>
    %92 = arith.addf %90, %91 : vector<16x128xf32>
    %cst_49 = arith.constant 5.000000e-01 : f32
    %93 = vector.broadcast %cst_49 : f32 to vector<16x128xf32>
    %94 = arith.mulf %93, %92 : vector<16x128xf32>
    %cst_50 = arith.constant 0.707106769 : f32
    %95 = vector.broadcast %cst_50 : f32 to vector<16x128xf32>
    %96 = arith.mulf %92, %95 : vector<16x128xf32>
    %97 = math.erf %96 : vector<16x128xf32>
    %cst_51 = arith.constant 1.000000e+00 : f32
    %98 = vector.broadcast %cst_51 : f32 to vector<16x128xf32>
    %99 = arith.addf %98, %97 : vector<16x128xf32>
    %100 = arith.mulf %94, %99 : vector<16x128xf32>
    %101 = arith.truncf %100 : vector<16x128xf32> to vector<16x128xbf16>
    %c0_52 = arith.constant 0 : index
    %c0_53 = arith.constant 0 : index
    %c0_54 = arith.constant 0 : index
    %102 = vector.load %arg6[%c0_52, %c0_53, %c0_54] : memref<1x128x128xbf16, #tpu.memory_space<vmem>>, vector<1x128x128xbf16>
    %103 = vector.shape_cast %102 : vector<1x128x128xbf16> to vector<128x128xbf16>
    %cst_55 = arith.constant dense<0.000000e+00> : vector<16x128xf32>
    %104 = tpu.matmul %101, %103, %cst_55 {dimension_numbers = #tpu.dot_dimension_numbers<[1], [0], [0], [1], [0, 0, 1, 1], [], []>} : vector<16x128xbf16>, vector<128x128xbf16>, vector<16x128xf32> -> vector<16x128xf32>
    %c0_56 = arith.constant 0 : index
    %c7 = arith.constant 7 : index
    %c0_57 = arith.constant 0 : index
    %105 = vector.load %arg3[%c0_56, %c7, %c0_57] : memref<1x16x128xf32, #tpu.memory_space<vmem>>, vector<1x1x128xf32>
    %106 = vector.shape_cast %105 : vector<1x1x128xf32> to vector<1x128xf32>
    %107 = vector.broadcast %106 : vector<1x128xf32> to vector<16x128xf32>
    %108 = arith.addf %104, %107 : vector<16x128xf32>
    %c0_58 = arith.constant 0 : index
    %c8 = arith.constant 8 : index
    %c0_59 = arith.constant 0 : index
    %109 = vector.load %arg3[%c0_58, %c8, %c0_59] : memref<1x16x128xf32, #tpu.memory_space<vmem>>, vector<1x1x128xf32>
    %110 = vector.shape_cast %109 : vector<1x1x128xf32> to vector<1x128xf32>
    %c0_60 = arith.constant 0 : index
    %c9 = arith.constant 9 : index
    %c0_61 = arith.constant 0 : index
    %111 = vector.load %arg3[%c0_60, %c9, %c0_61] : memref<1x16x128xf32, #tpu.memory_space<vmem>>, vector<1x1x128xf32>
    %112 = vector.shape_cast %111 : vector<1x1x128xf32> to vector<1x128xf32>
    %cst_62 = arith.constant dense<0.000000e+00> : vector<16xf32>
    %113 = vector.multi_reduction <add>, %108, %cst_62 [1] : vector<16x128xf32> to vector<16xf32>
    %114 = vector.shape_cast %113 : vector<16xf32> to vector<16x1xf32>
    %cst_63 = arith.constant 1.562500e-02 : f32
    %115 = vector.broadcast %cst_63 : f32 to vector<16x1xf32>
    %116 = arith.mulf %114, %115 : vector<16x1xf32>
    %117 = vector.broadcast %116 : vector<16x1xf32> to vector<16x128xf32>
    %118 = arith.subf %108, %117 : vector<16x128xf32>
    %119 = tpu.iota {dimensions = array<i32: 1>} : vector<1x128xi32>
    %c64_i32_64 = arith.constant 64 : i32
    %120 = vector.broadcast %c64_i32_64 : i32 to vector<1x128xi32>
    %121 = arith.cmpi slt, %119, %120 : vector<1x128xi32>
    %cst_65 = arith.constant 0.000000e+00 : f32
    %122 = vector.shape_cast %121 : vector<1x128xi1> to vector<1x128xi1>
    %123 = vector.broadcast %122 : vector<1x128xi1> to vector<16x128xi1>
    %124 = vector.broadcast %cst_65 : f32 to vector<16x128xf32>
    %125 = arith.select %123, %118, %124 : vector<16x128xi1>, vector<16x128xf32>
    %126 = arith.mulf %125, %125 : vector<16x128xf32>
    %cst_66 = arith.constant dense<0.000000e+00> : vector<16xf32>
    %127 = vector.multi_reduction <add>, %126, %cst_66 [1] : vector<16x128xf32> to vector<16xf32>
    %128 = vector.shape_cast %127 : vector<16xf32> to vector<16x1xf32>
    %cst_67 = arith.constant 1.562500e-02 : f32
    %129 = vector.broadcast %cst_67 : f32 to vector<16x1xf32>
    %130 = arith.mulf %128, %129 : vector<16x1xf32>
    %cst_68 = arith.constant 9.99999974E-6 : f32
    %131 = vector.broadcast %cst_68 : f32 to vector<16x1xf32>
    %132 = arith.addf %130, %131 : vector<16x1xf32>
    %133 = math.rsqrt %132 : vector<16x1xf32>
    %134 = vector.broadcast %133 : vector<16x1xf32> to vector<16x128xf32>
    %135 = arith.mulf %125, %134 : vector<16x128xf32>
    %136 = vector.broadcast %110 : vector<1x128xf32> to vector<16x128xf32>
    %137 = arith.mulf %135, %136 : vector<16x128xf32>
    %138 = vector.broadcast %112 : vector<1x128xf32> to vector<16x128xf32>
    %139 = arith.addf %137, %138 : vector<16x128xf32>
    %cst_69 = arith.constant 5.000000e-01 : f32
    %140 = vector.broadcast %cst_69 : f32 to vector<16x128xf32>
    %141 = arith.mulf %140, %139 : vector<16x128xf32>
    %cst_70 = arith.constant 0.707106769 : f32
    %142 = vector.broadcast %cst_70 : f32 to vector<16x128xf32>
    %143 = arith.mulf %139, %142 : vector<16x128xf32>
    %144 = math.erf %143 : vector<16x128xf32>
    %cst_71 = arith.constant 1.000000e+00 : f32
    %145 = vector.broadcast %cst_71 : f32 to vector<16x128xf32>
    %146 = arith.addf %145, %144 : vector<16x128xf32>
    %147 = arith.mulf %141, %146 : vector<16x128xf32>
    %148 = arith.truncf %147 : vector<16x128xf32> to vector<16x128xbf16>
    %c0_72 = arith.constant 0 : index
    %c0_73 = arith.constant 0 : index
    %c0_74 = arith.constant 0 : index
    %149 = vector.load %arg7[%c0_72, %c0_73, %c0_74] : memref<1x128x128xbf16, #tpu.memory_space<vmem>>, vector<1x128x128xbf16>
    %150 = vector.shape_cast %149 : vector<1x128x128xbf16> to vector<128x128xbf16>
    %cst_75 = arith.constant dense<0.000000e+00> : vector<16x128xf32>
    %151 = tpu.matmul %148, %150, %cst_75 {dimension_numbers = #tpu.dot_dimension_numbers<[1], [0], [0], [1], [0, 0, 1, 1], [], []>} : vector<16x128xbf16>, vector<128x128xbf16>, vector<16x128xf32> -> vector<16x128xf32>
    %c0_76 = arith.constant 0 : index
    %c10 = arith.constant 10 : index
    %c0_77 = arith.constant 0 : index
    %152 = vector.load %arg3[%c0_76, %c10, %c0_77] : memref<1x16x128xf32, #tpu.memory_space<vmem>>, vector<1x1x128xf32>
    %153 = vector.shape_cast %152 : vector<1x1x128xf32> to vector<1x128xf32>
    %154 = vector.broadcast %153 : vector<1x128xf32> to vector<16x128xf32>
    %155 = arith.addf %151, %154 : vector<16x128xf32>
    %c0_78 = arith.constant 0 : index
    %c11 = arith.constant 11 : index
    %c0_79 = arith.constant 0 : index
    %156 = vector.load %arg3[%c0_78, %c11, %c0_79] : memref<1x16x128xf32, #tpu.memory_space<vmem>>, vector<1x1x128xf32>
    %157 = vector.shape_cast %156 : vector<1x1x128xf32> to vector<1x128xf32>
    %c0_80 = arith.constant 0 : index
    %c12 = arith.constant 12 : index
    %c0_81 = arith.constant 0 : index
    %158 = vector.load %arg3[%c0_80, %c12, %c0_81] : memref<1x16x128xf32, #tpu.memory_space<vmem>>, vector<1x1x128xf32>
    %159 = vector.shape_cast %158 : vector<1x1x128xf32> to vector<1x128xf32>
    %cst_82 = arith.constant dense<0.000000e+00> : vector<16xf32>
    %160 = vector.multi_reduction <add>, %155, %cst_82 [1] : vector<16x128xf32> to vector<16xf32>
    %161 = vector.shape_cast %160 : vector<16xf32> to vector<16x1xf32>
    %cst_83 = arith.constant 6.250000e-02 : f32
    %162 = vector.broadcast %cst_83 : f32 to vector<16x1xf32>
    %163 = arith.mulf %161, %162 : vector<16x1xf32>
    %164 = vector.broadcast %163 : vector<16x1xf32> to vector<16x128xf32>
    %165 = arith.subf %155, %164 : vector<16x128xf32>
    %166 = tpu.iota {dimensions = array<i32: 1>} : vector<1x128xi32>
    %c16_i32 = arith.constant 16 : i32
    %167 = vector.broadcast %c16_i32 : i32 to vector<1x128xi32>
    %168 = arith.cmpi slt, %166, %167 : vector<1x128xi32>
    %cst_84 = arith.constant 0.000000e+00 : f32
    %169 = vector.shape_cast %168 : vector<1x128xi1> to vector<1x128xi1>
    %170 = vector.broadcast %169 : vector<1x128xi1> to vector<16x128xi1>
    %171 = vector.broadcast %cst_84 : f32 to vector<16x128xf32>
    %172 = arith.select %170, %165, %171 : vector<16x128xi1>, vector<16x128xf32>
    %173 = arith.mulf %172, %172 : vector<16x128xf32>
    %cst_85 = arith.constant dense<0.000000e+00> : vector<16xf32>
    %174 = vector.multi_reduction <add>, %173, %cst_85 [1] : vector<16x128xf32> to vector<16xf32>
    %175 = vector.shape_cast %174 : vector<16xf32> to vector<16x1xf32>
    %cst_86 = arith.constant 6.250000e-02 : f32
    %176 = vector.broadcast %cst_86 : f32 to vector<16x1xf32>
    %177 = arith.mulf %175, %176 : vector<16x1xf32>
    %cst_87 = arith.constant 9.99999974E-6 : f32
    %178 = vector.broadcast %cst_87 : f32 to vector<16x1xf32>
    %179 = arith.addf %177, %178 : vector<16x1xf32>
    %180 = math.rsqrt %179 : vector<16x1xf32>
    %181 = vector.broadcast %180 : vector<16x1xf32> to vector<16x128xf32>
    %182 = arith.mulf %172, %181 : vector<16x128xf32>
    %183 = vector.broadcast %157 : vector<1x128xf32> to vector<16x128xf32>
    %184 = arith.mulf %182, %183 : vector<16x128xf32>
    %185 = vector.broadcast %159 : vector<1x128xf32> to vector<16x128xf32>
    %186 = arith.addf %184, %185 : vector<16x128xf32>
    %c0_88 = arith.constant 0 : index
    %c13 = arith.constant 13 : index
    %c0_89 = arith.constant 0 : index
    %187 = vector.load %arg3[%c0_88, %c13, %c0_89] : memref<1x16x128xf32, #tpu.memory_space<vmem>>, vector<1x1x128xf32>
    %188 = vector.shape_cast %187 : vector<1x1x128xf32> to vector<1x128xf32>
    %189 = vector.broadcast %188 : vector<1x128xf32> to vector<16x128xf32>
    %190 = arith.mulf %189, %186 : vector<16x128xf32>
    %191 = arith.addf %54, %190 : vector<16x128xf32>
    %192 = arith.mulf %191, %191 : vector<16x128xf32>
    %cst_90 = arith.constant dense<0.000000e+00> : vector<16xf32>
    %193 = vector.multi_reduction <add>, %192, %cst_90 [1] : vector<16x128xf32> to vector<16xf32>
    %194 = vector.shape_cast %193 : vector<16xf32> to vector<16x1xf32>
    %195 = math.sqrt %194 : vector<16x1xf32>
    %cst_91 = arith.constant 9.99999996E-13 : f32
    %196 = vector.broadcast %cst_91 : f32 to vector<16x1xf32>
    %197 = arith.maximumf %195, %196 : vector<16x1xf32>
    %198 = vector.broadcast %197 : vector<16x1xf32> to vector<16x128xf32>
    %199 = arith.divf %191, %198 : vector<16x128xf32>
    %c0_92 = arith.constant 0 : index
    %c0_93 = arith.constant 0 : index
    %c0_94 = arith.constant 0 : index
    %200 = vector.load %arg9[%c0_92, %c0_93, %c0_94] : memref<1x16x128xf32, #tpu.memory_space<vmem>>, vector<1x16x128xf32>
    %201 = vector.shape_cast %200 : vector<1x16x128xf32> to vector<16x128xf32>
    %202 = vector.shape_cast %199 : vector<16x128xf32> to vector<1x16x128xf32>
    tpu.vector_store %arg9[%c0_92, %c0_93, %c0_94], %202 {strides = array<i32>} : memref<1x16x128xf32, #tpu.memory_space<vmem>>, vector<1x16x128xf32>,
    %203 = arith.truncf %199 : vector<16x128xf32> to vector<16x128xbf16>
    %c0_95 = arith.constant 0 : index
    %c0_96 = arith.constant 0 : index
    %c0_97 = arith.constant 0 : index
    %204 = vector.load %arg10[%c0_95, %c0_96, %c0_97] : memref<1x16x128xbf16, #tpu.memory_space<vmem>>, vector<1x16x128xbf16>
    %205 = vector.shape_cast %204 : vector<1x16x128xbf16> to vector<16x128xbf16>
    %206 = vector.shape_cast %203 : vector<16x128xbf16> to vector<1x16x128xbf16>
    tpu.vector_store %arg10[%c0_95, %c0_96, %c0_97], %206 {strides = array<i32>} : memref<1x16x128xbf16, #tpu.memory_space<vmem>>, vector<1x16x128xbf16>,
    return
  }
  func.func @transform_0(%arg0: i32, %arg1: i32) -> (i32, i32, i32) {
    %c0_i32 = arith.constant 0 : i32
    %c0_i32_0 = arith.constant 0 : i32
    return %arg0, %arg1, %c0_i32 : i32, i32, i32
  }
  func.func @transform_1(%arg0: i32, %arg1: i32) -> (i32, i32, i32) {
    %c0_i32 = arith.constant 0 : i32
    %c0_i32_0 = arith.constant 0 : i32
    %c0_i32_1 = arith.constant 0 : i32
    return %arg0, %c0_i32, %c0_i32_0 : i32, i32, i32
  }
  func.func @transform_2(%arg0: i32, %arg1: i32) -> (i32, i32, i32) {
    %c0_i32 = arith.constant 0 : i32
    %c0_i32_0 = arith.constant 0 : i32
    %c0_i32_1 = arith.constant 0 : i32
    return %arg0, %c0_i32, %c0_i32_0 : i32, i32, i32
  }
  func.func @transform_3(%arg0: i32, %arg1: i32) -> (i32, i32, i32) {
    %c0_i32 = arith.constant 0 : i32
    %c0_i32_0 = arith.constant 0 : i32
    %c0_i32_1 = arith.constant 0 : i32
    return %arg0, %c0_i32, %c0_i32_0 : i32, i32, i32
  }
  func.func @transform_4(%arg0: i32, %arg1: i32) -> (i32, i32, i32) {
    %c0_i32 = arith.constant 0 : i32
    %c0_i32_0 = arith.constant 0 : i32
    %c0_i32_1 = arith.constant 0 : i32
    return %arg0, %c0_i32, %c0_i32_0 : i32, i32, i32
  }
  func.func @transform_5(%arg0: i32, %arg1: i32) -> (i32, i32, i32) {
    %c0_i32 = arith.constant 0 : i32
    %c0_i32_0 = arith.constant 0 : i32
    %c0_i32_1 = arith.constant 0 : i32
    return %arg0, %c0_i32, %c0_i32_0 : i32, i32, i32
  }
  func.func @transform_6(%arg0: i32, %arg1: i32) -> (i32, i32, i32, i32) {
    %c0_i32 = arith.constant 0 : i32
    %c0_i32_0 = arith.constant 0 : i32
    %c0_i32_1 = arith.constant 0 : i32
    %c0_i32_2 = arith.constant 0 : i32
    return %arg0, %c0_i32, %c0_i32_0, %c0_i32_1 : i32, i32, i32, i32
  }
  func.func @transform_7(%arg0: i32, %arg1: i32) -> (i32, i32, i32) {
    %c0_i32 = arith.constant 0 : i32
    %c0_i32_0 = arith.constant 0 : i32
    return %arg0, %arg1, %c0_i32 : i32, i32, i32
  }
  func.func @transform_8(%arg0: i32, %arg1: i32) -> (i32, i32, i32) {
    %c0_i32 = arith.constant 0 : i32
    %c0_i32_0 = arith.constant 0 : i32
    return %arg0, %arg1, %c0_i32 : i32, i32, i32
  }
}

</mosaic_0001>

<bundles_post_ra>
// kernel: tpu_custom_call.1
= control target key start
LH: loop header
LB: loop body
LE: loop exit
PB: predicated region body
PF: predicated region fallthrough
CT: control target
= control target key end

     0   :  { %s2962_s0 = inlined_call_operand.hbm [shape: bf16[2,16,128], index: 0, kind: input, shape index: {}]   ;;  %s2963_s1 = inlined_call_operand.hbm [shape: f32[2,16,128], index: 1, kind: input, shape index: {}]   ;;  %s2964_s2 = inlined_call_operand.hbm [shape: bf16[2,128,128], index: 2, kind: input, shape index: {}]   ;;  %s2965_s3 = inlined_call_operand.hbm [shape: bf16[2,128,128], index: 3, kind: input, shape index: {}]   ;;  %s2966_s4 = inlined_call_operand.hbm [shape: bf16[2,128,128], index: 4, kind: input, shape index: {}]   ;;  %s2967_s5 = inlined_call_operand.hbm [shape: bf16[2,128,128], index: 5, kind: input, shape index: {}]   ;;  %s2968_s6 = inlined_call_operand.hbm [shape: bf16[2,2,128,128], index: 6, kind: input, shape index: {}]   ;;  %s2969_s7 = inlined_call_operand.hbm [shape: f32[2,16,128], index: 7, kind: output, shape index: {0}]   ;;  %s2970_s8 = inlined_call_operand.hbm [shape: bf16[2,16,128], index: 8, kind: output, shape index: {1}]  }
   0x1   :  { %2980 = sst [smem:[#allocation25_spill]] %s2963_s1 }
   0x2   :  { %2981 = sst [smem:[#allocation26_spill]] %s2965_s3 }
   0x3   :  { %2982 = sst [smem:[#allocation27_spill]] %s2969_s7 }
   0x4   :  { %2983 = sst [smem:[#allocation28_spill]] %s2970_s8 }
   0x5   :  { %14 = vsyncpa [#allocation3], 0 }
   0x6   :  { %16 = vsyncpa [#allocation3 + $0x1], 0 }
   0x7   :  { %17 = vsyncpa [#allocation6], 0 }
   0x8   :  { %18 = vsyncpa [#allocation9], 0 }
   0x9   :  { %19 = vsyncpa [#allocation12], 0 }
   0xa   :  { %20 = vsyncpa [#allocation4], 0 }
   0xb   :  { %22 = vsyncpa [#allocation4 + $0x1], 0 }
   0xc   :  { %23 = vsyncpa [#allocation16], 0 }
   0xd   :  { %25 = vsyncpa [#allocation16 + $0x1], 0  ;;  %s2498_s27 = smov 0   ;;  %s2500_s28 = smov 0  }
   0xe   :  { %s2502_s29 = smov 0   ;;  %s2504_s30 = smov 0  }
   0xf   :  { %s2506_s9 = smov 0   ;;  %s2508_s10 = smov 0  }
  0x10 LB: > { %2984 = sst [smem:[#allocation23_spill]] %s2412_s27  ;;  %s2975_s11 = sadd.s32 4294967295, %s2432_s10   ;;  %s2432_s10 = sphi %s2508_s10, %s31_s10   ;;  %s2428_s9 = sphi %s2506_s9, %s3010_s9   ;;  %s2424_s30 = sphi %s2504_s30, %s3009_s30   ;;  %s2420_s29 = sphi %s2502_s29, %s3008_s29   ;;  %s2416_s28 = sphi %s2500_s28, %s3007_s28   ;;  %s2412_s27 = sphi %s2498_s27, %s3006_s27  }
  0x11   : > { %s1632_s12 = sadd.s32 4294967294, %s2432_s10   ;;  %p65_p0 = scmp.ne.s32.totalorder %s2416_s28, %s2412_s27 }
  0x12   : > { %p66_p1 = scmp.eq.s32.totalorder %s2975_s11, 0  ;;  %p253_p2 = scmp.eq.s32.totalorder %s1632_s12, 1 }
  0x13   : > { %p1633_p3 = scmp.ge.s32.totalorder %s2432_s10, 1  ;;  %p288_p5 = scmp.lt.s32.totalorder %s2432_s10, 3 }
  0x14   : > { %p2535_p4 = por %p66_p1, %p65_p0  ;;  %p2540_p6 = por %p253_p2, %p65_p0 }
  0x15   : > { %s2971_s15 = sshll.u32 %s2424_s30, 8  ;;  %p2545_p7 = pnand %p1633_p3, %p288_p5 }
  0x16   : > { %s2985_s13 = scalar_select %p2535_p4, 1, 0 }
  0x17   : > { %s2986_s14 = scalar_select %p2540_p6, 1, 0 }
  0x18   : > { %s2988_s16 = scalar_select %p2545_p7, 1, 0 }
  0x19   : > { %2987 = sst [smem:[#allocation24_spill]] %s2986_s14  ;;  %p1937_p8 = pneg %p2545_p7 }
  0x1a   : > { %s2989_s1 = sld [smem:[#allocation25_spill]]  ;;  %s2434_s20 = smov [#allocation5]  }
  0x1b   : > { %s303_s21 = sshll.u32 %s2434_s20, 4  ;;  %p2562_p9 = pnand %p1937_p8, %p2535_p4  ;;  %s2558_s21 = int_to_ptr.vmem [resolvable:$true] %s303_s21 }
  0x1c   : > { %s2568_s23 = sshll.u32 %s2424_s30, 10 }
  0x1d   : > { %p2574_p12 = pneg %p2562_p9 }
  0x20   : > { %s2554_s19 = scalar_lea.hbm %s2989_s1, %s2971_s15  ;;  %s2119_s17 = scalar_lea.hbm %s2989_s1, 512 }
  0x21   : > { %s2114_s24 = scalar_lea.hbm %s2554_s19, 256  ;;  %p2120_p1 = scmp.lt.s32.totalorder %s2554_s19, %s2989_s1 }
  0x22   : > { %p2115_p11 = scmp.ne.s32.totalorder %s2554_s19, %s2114_s24  ;;  %p2121_p2 = scmp.lt.s32.totalorder %s2119_s17, %s2114_s24 }
  0x24   : > { %p2117_p13 = pnand %p2574_p12, %p2115_p11  ;;  %p2122_p3 = por %p2121_p2, %p2120_p1 }
  0x26   : > { %p2118_p0 = pneg %p2117_p13 }
  0x28   : > { %p2123_p5 = pnand %p2122_p3, %p2118_p0 }
  0x2a   : > { %2126 = shalt.err (!%p2123_p5)
}
  0x2b   : > { %s2127_s15 = scalar_lea.vmem %s2558_s21, 256  ;;  %p2135_p10 = scmp.lt.s32.totalorder %s2558_s21, %s2558_s21 }
  0x2c   : > { %p2128_p8 = scmp.ne.s32.totalorder %s2558_s21, %s2127_s15  ;;  %p2136_p6 = scmp.lt.s32.totalorder %s2127_s15, %s2127_s15 }
  0x2e   : > { %p2130_p11 = pnand %p2128_p8, %p2574_p12  ;;  %p2137_p4 = por %p2136_p6, %p2135_p10 }
  0x30   : > { %p2131_p13 = pneg %p2130_p11 }
  0x32   : > { %p2138_p7 = pnand %p2137_p4, %p2131_p13 }
  0x34   : > { %2141 = shalt.err (!%p2138_p7)
}
  0x35   : > { %s2435_s26 = smov 128   ;;  %s2436_s24 = smov 8  }
  0x36   : > { %1940 = dma.hbm_to_vmem [thread:$0]  (!%p2562_p9), %s2554_s19, 256, %s2558_s21, [#allocation6], %s2435_s26, %s2435_s26, %s2436_s24  }
  0x37   : > { %s2992_s3 = sld [smem:[#allocation26_spill]]  ;;  %s2437_s15 = smov [#allocation8]  }
  0x38   : > { %s335_s20 = sshll.u32 %s2437_s15, 4  ;;  %s2607_s14 = scalar_lea.hbm %s2967_s5, %s2568_s23  ;;  %s336_s20 = int_to_ptr.vmem [resolvable:$true] %s335_s20 }
  0x3d   : > { %s2601_s18 = scalar_lea.hbm %s2992_s3, %s2568_s23  ;;  %s2147_s26 = scalar_lea.hbm %s2992_s3, 2048 }
  0x3e   : > { %s2142_s27 = scalar_lea.hbm %s2601_s18, 1024  ;;  %p2148_p10 = scmp.lt.s32.totalorder %s2601_s18, %s2992_s3 }
  0x3f   : > { %p2143_p4 = scmp.ne.s32.totalorder %s2601_s18, %s2142_s27  ;;  %p2149_p0 = scmp.lt.s32.totalorder %s2147_s26, %s2142_s27 }
  0x41   : > { %p2145_p6 = pnand %p2143_p4, %p2574_p12  ;;  %p2150_p1 = por %p2149_p0, %p2148_p10 }
  0x43   : > { %p2146_p7 = pneg %p2145_p6 }
  0x45   : > { %p2151_p2 = pnand %p2150_p1, %p2146_p7 }
  0x47   : > { %2154 = shalt.err (!%p2151_p2)
}
  0x48   : > { %s2155_s1 = scalar_lea.vmem %s336_s20, 1024  ;;  %p2163_p11 = scmp.lt.s32.totalorder %s336_s20, %s336_s20 }
  0x49   : > { %p2156_p3 = scmp.ne.s32.totalorder %s336_s20, %s2155_s1  ;;  %p2164_p13 = scmp.lt.s32.totalorder %s2155_s1, %s2155_s1 }
  0x4b   : > { %p2158_p5 = pnand %p2156_p3, %p2574_p12  ;;  %p2165_p4 = por %p2164_p13, %p2163_p11 }
  0x4d   : > { %p2159_p8 = pneg %p2158_p5 }
  0x4f   : > { %p2166_p6 = pnand %p2165_p4, %p2159_p8 }
  0x51   : > { %2169 = shalt.err (!%p2166_p6)
}
  0x52   : > { %s2438_s11 = smov 64   ;;  %s2439_s27 = smov 4  }
  0x53   : > { %1946 = dma.hbm_to_vmem [thread:$0]  (!%p2562_p9), %s2601_s18, 1024, %s336_s20, [#allocation9], %s2438_s11, %s2438_s11, %s2439_s27  }
  0x54   : > { %s2440_s17 = smov [#allocation11]   ;;  %s2632_s26 = scalar_lea.hbm %s2964_s2, %s2568_s23 }
  0x55   : > { %s367_s15 = sshll.u32 %s2440_s17, 4  ;;  %s2170_s24 = scalar_lea.hbm %s2607_s14, 1024  ;;  %s368_s15 = int_to_ptr.vmem [resolvable:$true] %s367_s15 }
  0x56   : > { %p2171_p7 = scmp.ne.s32.totalorder %s2607_s14, %s2170_s24  ;;  %s2175_s3 = scalar_lea.hbm %s2967_s5, 2048 }
  0x57   : > { %p2176_p1 = scmp.lt.s32.totalorder %s2607_s14, %s2967_s5  ;;  %p2177_p2 = scmp.lt.s32.totalorder %s2175_s3, %s2170_s24 }
  0x58   : > { %p2173_p10 = pnand %p2171_p7, %p2574_p12 }
  0x59   : > { %p2178_p3 = por %p2177_p2, %p2176_p1 }
  0x5a   : > { %p2174_p0 = pneg %p2173_p10 }
  0x5c   : > { %p2179_p5 = pnand %p2178_p3, %p2174_p0 }
  0x5e   : > { %2182 = shalt.err (!%p2179_p5)
}
  0x5f   : > { %s2183_s18 = scalar_lea.vmem %s368_s15, 1024  ;;  %p2191_p4 = scmp.lt.s32.totalorder %s368_s15, %s368_s15 }
  0x60   : > { %p2184_p8 = scmp.ne.s32.totalorder %s368_s15, %s2183_s18  ;;  %p2192_p6 = scmp.lt.s32.totalorder %s2183_s18, %s2183_s18 }
  0x62   : > { %p2186_p11 = pnand %p2184_p8, %p2574_p12  ;;  %p2193_p7 = por %p2192_p6, %p2191_p4 }
  0x64   : > { %p2187_p13 = pneg %p2186_p11 }
  0x66   : > { %p2194_p10 = pnand %p2193_p7, %p2187_p13 }
  0x68   : > { %2197 = shalt.err (!%p2194_p10)
}
  0x69   : > { %1952 = dma.hbm_to_vmem [thread:$0]  (!%p2562_p9), %s2607_s14, 1024, %s368_s15, [#allocation12], %s2438_s11, %s2438_s11, %s2439_s27  }
  0x6a   : > { %s2441_s3 = smov [#allocation7]   ;;  %s2657_s17 = scalar_lea.hbm %s2966_s4, %s2568_s23 }
  0x6b   : > { %s319_s7 = sshll.u32 %s2441_s3, 4  ;;  %s2198_s19 = scalar_lea.hbm %s2632_s26, 1024  ;;  %s320_s7 = int_to_ptr.vmem [resolvable:$true] %s319_s7 }
  0x6c   : > { %p2199_p0 = scmp.ne.s32.totalorder %s2632_s26, %s2198_s19  ;;  %s2203_s12 = scalar_lea.hbm %s2964_s2, 2048 }
  0x6d   : > { %p2204_p3 = scmp.lt.s32.totalorder %s2632_s26, %s2964_s2  ;;  %p2205_p5 = scmp.lt.s32.totalorder %s2203_s12, %s2198_s19 }
  0x6e   : > { %p2201_p1 = pnand %p2199_p0, %p2574_p12 }
  0x6f   : > { %p2206_p8 = por %p2205_p5, %p2204_p3 }
  0x70   : > { %p2202_p2 = pneg %p2201_p1 }
  0x72   : > { %p2207_p11 = pnand %p2206_p8, %p2202_p2 }
  0x74   : > { %2210 = shalt.err (!%p2207_p11)
}
  0x75   : > { %s2211_s14 = scalar_lea.vmem %s320_s7, 1024  ;;  %p2219_p7 = scmp.lt.s32.totalorder %s320_s7, %s320_s7 }
  0x76   : > { %p2212_p13 = scmp.ne.s32.totalorder %s320_s7, %s2211_s14  ;;  %p2220_p10 = scmp.lt.s32.totalorder %s2211_s14, %s2211_s14 }
  0x78   : > { %p2214_p4 = pnand %p2212_p13, %p2574_p12  ;;  %p2221_p0 = por %p2220_p10, %p2219_p7 }
  0x7a   : > { %p2215_p6 = pneg %p2214_p4 }
  0x7c   : > { %p2222_p1 = pnand %p2221_p0, %p2215_p6 }
  0x7e   : > { %2225 = shalt.err (!%p2222_p1)
}
  0x7f   : > { %1943 = dma.hbm_to_vmem [thread:$0]  (!%p2562_p9), %s2632_s26, 1024, %s320_s7, [#allocation6], %s2438_s11, %s2438_s11, %s2439_s27  }
  0x80   : > { %s2442_s23 = smov [#allocation10]   ;;  %s1734_s3 = sshll.u32 %s2424_s30, 11 }
  0x81   : > { %s351_s15 = sshll.u32 %s2442_s23, 4  ;;  %s2682_s19 = scalar_lea.hbm %s2968_s6, %s1734_s3  ;;  %s352_s15 = int_to_ptr.vmem [resolvable:$true] %s351_s15 }
  0x82   : > { %s2226_s21 = scalar_lea.hbm %s2657_s17, 1024  ;;  %s2231_s1 = scalar_lea.hbm %s2966_s4, 2048 }
  0x83   : > { %p2227_p2 = scmp.ne.s32.totalorder %s2657_s17, %s2226_s21  ;;  %p2232_p8 = scmp.lt.s32.totalorder %s2657_s17, %s2966_s4 }
  0x84   : > { %p2233_p11 = scmp.lt.s32.totalorder %s2231_s1, %s2226_s21 }
  0x85   : > { %p2229_p3 = pnand %p2227_p2, %p2574_p12 }
  0x86   : > { %p2234_p13 = por %p2233_p11, %p2232_p8 }
  0x87   : > { %p2230_p5 = pneg %p2229_p3 }
  0x89   : > { %p2235_p4 = pnand %p2234_p13, %p2230_p5 }
  0x8b   : > { %2238 = shalt.err (!%p2235_p4)
}
  0x8c   : > { %s2239_s7 = scalar_lea.vmem %s352_s15, 1024  ;;  %p2247_p0 = scmp.lt.s32.totalorder %s352_s15, %s352_s15 }
  0x8d   : > { %p2240_p6 = scmp.ne.s32.totalorder %s352_s15, %s2239_s7  ;;  %p2248_p1 = scmp.lt.s32.totalorder %s2239_s7, %s2239_s7 }
  0x8f   : > { %p2242_p7 = pnand %p2240_p6, %p2574_p12  ;;  %p2249_p2 = por %p2248_p1, %p2247_p0 }
  0x91   : > { %p2243_p10 = pneg %p2242_p7 }
  0x93   : > { %p2250_p3 = pnand %p2249_p2, %p2243_p10 }
  0x95   : > { %2253 = shalt.err (!%p2250_p3)
}
  0x96   : > { %1949 = dma.hbm_to_vmem [thread:$0]  (!%p2562_p9), %s2657_s17, 1024, %s352_s15, [#allocation9], %s2438_s11, %s2438_s11, %s2439_s27  }
  0x97   : > { %s2443_s14 = smov [#allocation13]   ;;  %s2254_s3 = scalar_lea.hbm %s2682_s19, 2048 }
  0x98   : > { %s383_s23 = sshll.u32 %s2443_s14, 4  ;;  %p2255_p5 = scmp.ne.s32.totalorder %s2682_s19, %s2254_s3  ;;  %s384_s23 = int_to_ptr.vmem [resolvable:$true] %s383_s23 }
  0x99   : > { %s2259_s21 = scalar_lea.hbm %s2968_s6, 4096  ;;  %p2260_p13 = scmp.lt.s32.totalorder %s2682_s19, %s2968_s6 }
  0x9a   : > { %p2257_p8 = pnand %p2255_p5, %p2574_p12  ;;  %p2261_p4 = scmp.lt.s32.totalorder %s2259_s21, %s2254_s3 }
  0x9c   : > { %p2258_p11 = pneg %p2257_p8  ;;  %p2262_p6 = por %p2261_p4, %p2260_p13 }
  0x9e   : > { %p2263_p7 = pnand %p2262_p6, %p2258_p11 }
  0xa0   : > { %2266 = shalt.err (!%p2263_p7)
}
  0xa1   : > { %s2267_s17 = scalar_lea.vmem %s384_s23, 2048  ;;  %p2275_p2 = scmp.lt.s32.totalorder %s384_s23, %s384_s23 }
  0xa2   : > { %p2268_p10 = scmp.ne.s32.totalorder %s384_s23, %s2267_s17  ;;  %p2276_p3 = scmp.lt.s32.totalorder %s2267_s17, %s2267_s17 }
  0xa4   : > { %p2270_p0 = pnand %p2268_p10, %p2574_p12  ;;  %p2277_p5 = por %p2276_p3, %p2275_p2 }
  0xa6   : > { %p2271_p1 = pneg %p2270_p0 }
  0xa8   : > { %p2278_p8 = pnand %p2277_p5, %p2271_p1 }
  0xaa   : > { %2281 = shalt.err (!%p2278_p8)
}
  0xab   : > { %1955 = dma.hbm_to_vmem [thread:$0]  (!%p2562_p9), %s2682_s19, 2048, %s384_s23, [#allocation12], %s2438_s11, %s2438_s11, %s2439_s27  }
  0xac   : > { %s43_s25 = sadd.s32 1, %s2428_s9  ;;  %s52_s15 = sadd.s32 1, %s2420_s29 }
  0xad   : > { %p45_p12 = scmp.ge.s32.totalorder %s43_s25, 2  ;;  %p59_p11 = scmp.ne.s32.totalorder %s2420_s29, %s2416_s28 }
  0xae   : > { %p60_p13 = scmp.eq.s32.totalorder %s2432_s10, 0  ;;  %s2994_s1 = sadd.s32 4294967295, %s2432_s10  }
  0xaf   : > { %s3012_s25 = smov (%p45_p12, %s43_s25), 0  ;;  %p247_p6 = scmp.eq.s32.totalorder %s2994_s1, 1 }
  0xb0   : > { %p2729_p4 = por %p60_p13, %p59_p11  ;;  %s47_s18 = ssub.s32 %s2428_s9, %s3012_s25 }
  0xb1   : > { %p1967_p7 = scmp.lt.s32.totalorder %s2432_s10, 2  ;;  %p50_p10 = scmp.eq.s32.totalorder %s47_s18, 0 }
  0xb2   : > { %p2738_p0 = por %p247_p6, %p59_p11  ;;  %s397_s26 = sand.u32 1, %s2420_s29  }
  0xb3   : > { %s1735_s7 = sshll.u32 %s2428_s9, 7  ;;  %s1647_s23 = sshll.u32 %s397_s26, 3 }
  0xb4   : > { %s2745_s14 = scalar_select %p50_p10, %s2420_s29, %s52_s15  }
  0xb5   : > { %s409_s20 = scalar_lea.hbm %s2962_s0, %s1735_s7  ;;  %s401_s21 = scalar_lea.vmem [#allocation2], %s1647_s23 }
  0xb6   : > { %s410_s24 = sshll.u32 %s401_s21, 4  ;;  %p2752_p9 = pnand %p1967_p7, %p2729_p4  ;;  %s411_s24 = int_to_ptr.vmem [resolvable:$true] %s410_s24 }
  0xb7   : > { %s398_s17 = scalar_lea.sflag [#allocation3], %s397_s26  ;;  %s2295_s1 = scalar_lea.vmem %s411_s24, 128 }
  0xb8   : > { %p2284_p1 = pneg %p2752_p9  ;;  %p2296_p2 = scmp.ne.s32.totalorder %s411_s24, %s2295_s1 }
  0xb9   : > { %s2444_s15 = smov [#allocation2]  }
  0xba   : > { %p2298_p3 = pnand %p2296_p2, %p2284_p1  ;;  %s2300_s18 = sshll.u32 %s2444_s15, 4  ;;  %s2301_s18 = int_to_ptr.vmem [resolvable:$false] %s2300_s18 }
  0xbb   : > { %s2302_s7 = scalar_lea.vmem %s2301_s18, 256  ;;  %p2303_p8 = scmp.lt.s32.totalorder %s411_s24, %s2301_s18 }
  0xbc   : > { %p2299_p5 = pneg %p2298_p3  ;;  %p2304_p12 = scmp.lt.s32.totalorder %s2302_s7, %s2295_s1 }
  0xbe   : > { %p2305_p11 = por %p2304_p12, %p2303_p8 }
  0xc0   : > { %p2306_p13 = pnand %p2305_p11, %p2299_p5 }
  0xc2   : > { %2309 = shalt.err (!%p2306_p13)
}
  0xc3   : > { %1959 = dma.hbm_to_vmem [thread:$0]  (!%p2752_p9), %s409_s20, 128, %s411_s24, %s398_s17, %s2438_s11, %s2438_s11, %s2439_s27  }
  0xc4   : > { %p2997_p4 = scmp.ne.s32.totalorder %s2988_s16, 0 }
  0xc5   : > { %s2766_s22 = sand.u32 (!%p2997_p4), 1, %s2416_s28   ;;  %p2998_p6 = scmp.ne.s32.totalorder (!%p2997_p4), %s2985_s13, 0 }
  0xc6   : > { %422 = sbr.rel (%p2997_p4) target bundleno = 2735 (0xaaf), region = 48  ;;  %s1651_s26 = sshll.u32 (!%p2997_p4), %s2766_s22, 3 }
  0xc7   : > { %s425_s23 = scalar_lea.sflag (!%p2997_p4), [#allocation3], %s2766_s22  ;;  %s2772_s3 = scalar_lea.vmem (!%p2997_p4), [#allocation2], %s1651_s26 }
  0xcb   : > { %2387 = dma.done.wait (%p2998_p6), %s425_s23, 128  }
  0xcc   : > { %2389 = vsyncadd (%p2998_p6), %s425_s23, 4294967168 }
  0xcd   : > { %2391 = dma.done.wait (%p2998_p6), [#allocation6], 1280  }
  0xce   : > { %2393 = vsyncadd (%p2998_p6), [#allocation6], 4294966016 }
  0xcf   : > { %2395 = dma.done.wait (%p2998_p6), [#allocation9], 2048  }
  0xd0   : > { %2397 = vsyncadd (%p2998_p6), [#allocation9], 4294965248 }
  0xd1   : > { %2399 = dma.done.wait (%p2998_p6), [#allocation12], 3072  }
  0xd2   : > { %2401 = vsyncadd (%p2998_p6), [#allocation12], 4294964224  ;;  %v2445_v0 = vmov 0.0   ;;  %vm2446_vm0 = vmmov 0   ;;  %v2033_v1 = vld [vmem:[#allocation13 + $0x38] sm:$0xff]   ;;  %v2034_v2 = vld [vmem:[#allocation13 + $0x30] sm:$0xff]  }
  0xd3   : > { %1799 = vmatprep.subr.bf16.mxu0 %v2445_v0  ;;  %1815 = vmatprep.mubr.msk.bf16.mxu0 %vm2446_vm0, %v2445_v0  ;;  %v2035_v3 = vld [vmem:[#allocation13 + $0x28] sm:$0xff]   ;;  %v2042_v4 = vld [vmem:[#allocation13 + $0x78] sm:$0xff]   ;;  %v2036_v5 = vld [vmem:[#allocation13 + $0x20] sm:$0xff]   ;;  %s1652_s13 = sshll.u32 %s2766_s22, 4  ;;  %s2999_s27 = sshll.u32 %s2424_s30, 8 }
  0xd4   : > { %1819 = vmatprep.subr.bf16.mxu1 %v2445_v0  ;;  %1835 = vmatprep.mubr.msk.bf16.mxu1 %vm2446_vm0, %v2445_v0  ;;  %v2043_v6 = vld [vmem:[#allocation13 + $0x70] sm:$0xff]   ;;  %v2037_v7 = vld [vmem:[#allocation13 + $0x18] sm:$0xff]   ;;  %v2044_v8 = vld [vmem:[#allocation13 + $0x68] sm:$0xff]   ;;  %s482_s16 = scalar_lea.vmem [#allocation14], %s1652_s13  ;;  %s3000_s21 = sld [smem:[#allocation27_spill]] }
  0xd5   : > { %1800 = vmatpush3.bf16.msra.mxu0 %v2033_v1  ;;  %1820 = vmatpush3.bf16.msra.mxu1 %v2042_v4  ;;  %v2038_v9 = vld [vmem:[#allocation13 + $0x10] sm:$0xff]   ;;  %v2045_v10 = vld [vmem:[#allocation13 + $0x60] sm:$0xff]   ;;  %v2039_v11 = vld [vmem:[#allocation13 + $0x8] sm:$0xff]   ;;  %s1422_s11 = sshll.u32 %s482_s16, 4  ;;  %s1739_s12 = sshll.u32 %s2424_s30, 7  ;;  %s2883_s11 = int_to_ptr.vmem [resolvable:$true] %s1422_s11 }
  0xd6   : > { %1801 = vmatprep.subr.bf16.mxu0 %v2445_v0  ;;  %1821 = vmatprep.subr.bf16.mxu1 %v2445_v0  ;;  %v2046_v12 = vld [vmem:[#allocation13 + $0x58] sm:$0xff]   ;;  %v2040_v13 = vld [vmem:[#allocation13] sm:$0xff]   ;;  %v2047_v15 = vld [vmem:[#allocation13 + $0x50] sm:$0xff]   ;;  %s2880_s17 = scalar_lea.vmem [#allocation15], %s1651_s26  ;;  %s3001_s7 = sld [smem:[#allocation28_spill]] }
  0xd7   : > { %v2041_v14 = vld [vmem:[%s2772_s3] sm:$0xff]   ;;  %v1654_v18 = vld [vmem:[#allocation5 + $0xe] ss:$0 sm:$0xff]  ;;  %v1664_v28 = vld [vmem:[#allocation5 + $0xf] ss:$0 sm:$0xff]  ;;  %s1440_s1 = sshll.u32 %s2880_s17, 4  ;;  %s2890_s1 = int_to_ptr.vmem [resolvable:$true] %s1440_s1 }
  0xd8   : > { %v2048_v16 = vld [vmem:[#allocation13 + $0x48] sm:$0xff]   ;;  %v2049_v17 = vld [vmem:[#allocation13 + $0x40] sm:$0xff]   ;;  %v1673_v32 = vld [vmem:[#allocation5 + $0x2] ss:$0 sm:$0xff]  ;;  %s1402_s30 = scalar_lea.sflag [#allocation4], %s2766_s22  ;;  %s2310_s26 = scalar_lea.vmem %s2883_s11, 256 }
  0xd9   : > { %1802 = vmatpush3.bf16.msra.mxu0 %v2034_v2  ;;  %1822 = vmatpush3.bf16.msra.mxu1 %v2043_v6  ;;  %v2050_v40 = vld [vmem:[#allocation7 + $0x38] sm:$0xff]   ;;  %v2052_v50 = vld [vmem:[#allocation7 + $0x30] sm:$0xff]   ;;  %v2054_v52 = vld [vmem:[#allocation7 + $0x28] sm:$0xff]   ;;  %p2311_p7 = scmp.ne.s32.totalorder %s2883_s11, %s2310_s26  ;;  %s2447_s3 = smov [#allocation14]  }
  0xda   : > { %1803 = vmatprep.subr.bf16.mxu0 %v2445_v0  ;;  %1823 = vmatprep.subr.bf16.mxu1 %v2445_v0  ;;  %v2051_v41 = vld [vmem:[#allocation8 + $0x38] sm:$0xff]   ;;  %v2053_v51 = vld [vmem:[#allocation8 + $0x30] sm:$0xff]   ;;  %v2055_v53 = vld [vmem:[#allocation8 + $0x28] sm:$0xff]   ;;  %s2875_s24 = scalar_lea.hbm %s3000_s21, %s2999_s27  ;;  %s2314_s13 = sshll.u32 %s2447_s3, 4  ;;  %s2315_s13 = int_to_ptr.vmem [resolvable:$false] %s2314_s13 }
  0xdb   : > { %v2056_v54 = vld [vmem:[#allocation7 + $0x20] sm:$0xff]   ;;  %v2058_v56 = vld [vmem:[#allocation7 + $0x18] sm:$0xff]   ;;  %v2060_v58 = vld [vmem:[#allocation7 + $0x10] sm:$0xff]   ;;  %p2312_p10 = pnand %p2311_p7, %p2738_p0  ;;  %s2316_s27 = scalar_lea.vmem %s2315_s13, 512 }
  0xdc   : > { %v2057_v55 = vld [vmem:[#allocation8 + $0x20] sm:$0xff]   ;;  %v2059_v57 = vld [vmem:[#allocation8 + $0x18] sm:$0xff]   ;;  %v2061_v59 = vld [vmem:[#allocation8 + $0x10] sm:$0xff]   ;;  %s2888_s23 = scalar_lea.hbm %s3001_s7, %s1739_s12  ;;  %p2317_p1 = scmp.lt.s32.totalorder %s2883_s11, %s2315_s13 }
  0xdd   : > { %1804 = vmatpush3.bf16.msra.mxu0 %v2035_v3  ;;  %1824 = vmatpush3.bf16.msra.mxu1 %v2044_v8  ;;  %v2062_v60 = vld [vmem:[#allocation7 + $0x8] sm:$0xff]   ;;  %v2064_v62 = vld [vmem:[#allocation7] sm:$0xff]   ;;  %p2313_p9 = pneg %p2312_p10  ;;  %p2318_p2 = scmp.lt.s32.totalorder %s2316_s27, %s2310_s26 }
  0xde   : > { %1805 = vmatprep.subr.bf16.mxu0 %v2445_v0  ;;  %1825 = vmatprep.subr.bf16.mxu1 %v2445_v0  ;;  %v2063_v61 = vld [vmem:[#allocation8 + $0x8] sm:$0xff]   ;;  %v2065_v63 = vld [vmem:[#allocation8] sm:$0xff]  }
  0xdf   : > { %p2319_p3 = por %p2318_p2, %p2317_p1 }
  0xe1   : > { %1806 = vmatpush3.bf16.msra.mxu0 %v2036_v5  ;;  %1826 = vmatpush3.bf16.msra.mxu1 %v2045_v10  ;;  %p2320_p5 = pnand %p2319_p3, %p2313_p9 }
  0xe2   : > { %1807 = vmatprep.subr.bf16.mxu0 %v2445_v0  ;;  %1827 = vmatprep.subr.bf16.mxu1 %v2445_v0 }
  0xe5   : > { %1808 = vmatpush3.bf16.msra.mxu0 %v2037_v7  ;;  %1828 = vmatpush3.bf16.msra.mxu1 %v2046_v12  ;;  %v1674_v7 = vld [vmem:[#allocation5] ss:$0 sm:$0xff] }
  0xe6   : > { %1809 = vmatprep.subr.bf16.mxu0 %v2445_v0  ;;  %1829 = vmatprep.subr.bf16.mxu1 %v2445_v0 }
  0xe9   : > { %1810 = vmatpush3.bf16.msra.mxu0 %v2038_v9  ;;  %1830 = vmatpush3.bf16.msra.mxu1 %v2047_v15 }
  0xea   : > { %1811 = vmatprep.subr.bf16.mxu0 %v2445_v0  ;;  %1831 = vmatprep.subr.bf16.mxu1 %v2445_v0 }
  0xed   : > { %1812 = vmatpush3.bf16.msra.mxu0 %v2039_v11  ;;  %1832 = vmatpush3.bf16.msra.mxu1 %v2048_v16  ;;  %v1675_v11 = vld [vmem:[#allocation5 + $0x1] ss:$0 sm:$0xff]  ;;  %v1685_v16 = vld [vmem:[#allocation5 + $0x4] ss:$0 sm:$0xff] }
  0xee   : > { %1813 = vmatprep.subr.bf16.mxu0 %v2445_v0  ;;  %1833 = vmatprep.subr.bf16.mxu1 %v2445_v0 }
  0xf1   : > { %1814 = vmatpush3.bf16.msra.mxu0 %v2040_v13  ;;  %1834 = vmatpush3.bf16.msra.mxu1 %v2049_v17 }
  0xf2   : > { %1839 = vmatprep.subr.bf16.mxu0 %v2445_v0  ;;  %1859 = vmatprep.subr.bf16.mxu1 %v2445_v0 }
  0xf4   : > { %1816 = vmatmul.mubr.bf16.vlgmr.msra.gmra.mxu0 %v2041_v14 }
  0xf5   : > { %1855 = vmatprep.mubr.msk.bf16.mxu0 %vm2446_vm0, %v2445_v0  ;;  %1840 = vmatpush3.bf16.msra.mxu0 %v2050_v40  ;;  %v2067_v40 = vld [vmem:[#allocation10 + $0x30] sm:$0xff]  }
  0xf6   : > { %1841 = vmatprep.subr.bf16.mxu0 %v2445_v0 }
  0xf9   : > { %1842 = vmatpush3.bf16.msra.mxu0 %v2052_v50 }
  0xfa   : > { %1843 = vmatprep.subr.bf16.mxu0 %v2445_v0 }
  0xfd   : > { %1844 = vmatpush3.bf16.msra.mxu0 %v2054_v52 }
  0xfe   : > { %1845 = vmatprep.subr.bf16.mxu0 %v2445_v0 }
 0x101   : > { %1846 = vmatpush3.bf16.msra.mxu0 %v2056_v54  ;;  %v1694_v54 = vld [vmem:[#allocation5 + $0x5] ss:$0 sm:$0xff] }
 0x102   : > { %1847 = vmatprep.subr.bf16.mxu0 %v2445_v0 }
 0x105   : > { %1848 = vmatpush3.bf16.msra.mxu0 %v2058_v56  ;;  %v1695_v56 = vld [vmem:[#allocation5 + $0x6] ss:$0 sm:$0xff] }
 0x106   : > { %1849 = vmatprep.subr.bf16.mxu0 %v2445_v0 }
 0x109   : > { %1850 = vmatpush3.bf16.msra.mxu0 %v2060_v58 }
 0x10a   : > { %1851 = vmatprep.subr.bf16.mxu0 %v2445_v0 }
 0x10d   : > { %1852 = vmatpush3.bf16.msra.mxu0 %v2062_v60 }
 0x10e   : > { %1853 = vmatprep.subr.bf16.mxu0 %v2445_v0 }
 0x111   : > { %1854 = vmatpush3.bf16.msra.mxu0 %v2064_v62 }
 0x112   : > { %1879 = vmatprep.subr.bf16.mxu0 %v2445_v0 }
 0x1b4   : > { %v605_v19 = vpop.f32.mrf.mxu0 }
 0x1b5   : > { %v606_v21 = vadd.f32 %v1654_v18, %v605_v19 }
 0x1b6   : > { %v1817_v20 = vpop.f32.mrf.mxu0 }
 0x1b7   : > { %v612_v25 = vmax.f32 %v606_v21, 0.0 }
 0x1b8   : > { %v608_v22 = vpop.f32.mrf.mxu0 }
 0x1b9   : > { %v609_v23 = vadd.f32 %v1654_v18, %v608_v22 }
 0x1ba   : > { %v1818_v24 = vpop.f32.mrf.mxu0 }
 0x1bb   : > { %v613_v26 = vmax.f32 %v609_v23, 0.0 }
 0x1bd   : > { %v614_v27 = vpack.c.bf16 %v613_v26, %v612_v25 }
 0x1bf   : > { %1836 = vmatmul.mubr.bf16.vlgmr.msra.gmra.mxu1 %v614_v27  ;;  %v1000_v27 = vlaneseq }
 0x1c0   : > { %1875 = vmatprep.mubr.msk.bf16.mxu1 %vm2446_vm0, %v2445_v0  ;;  %1860 = vmatpush3.bf16.msra.mxu1 %v2051_v41  ;;  %v2068_v41 = vld [vmem:[#allocation10 + $0x28] sm:$0xff]  }
 0x1c1   : > { %1861 = vmatprep.subr.bf16.mxu1 %v2445_v0 }
 0x1c4   : > { %1862 = vmatpush3.bf16.msra.mxu1 %v2053_v51 }
 0x1c5   : > { %1863 = vmatprep.subr.bf16.mxu1 %v2445_v0 }
 0x1c8   : > { %1864 = vmatpush3.bf16.msra.mxu1 %v2055_v53 }
 0x1c9   : > { %1865 = vmatprep.subr.bf16.mxu1 %v2445_v0 }
 0x1cc   : > { %1866 = vmatpush3.bf16.msra.mxu1 %v2057_v55 }
 0x1cd   : > { %1867 = vmatprep.subr.bf16.mxu1 %v2445_v0 }
 0x1d0   : > { %1868 = vmatpush3.bf16.msra.mxu1 %v2059_v57 }
 0x1d1   : > { %1869 = vmatprep.subr.bf16.mxu1 %v2445_v0 }
 0x1d4   : > { %1870 = vmatpush3.bf16.msra.mxu1 %v2061_v59 }
 0x1d5   : > { %1871 = vmatprep.subr.bf16.mxu1 %v2445_v0 }
 0x1d8   : > { %1872 = vmatpush3.bf16.msra.mxu1 %v2063_v61 }
 0x1d9   : > { %1873 = vmatprep.subr.bf16.mxu1 %v2445_v0 }
 0x1dc   : > { %1874 = vmatpush3.bf16.msra.mxu1 %v2065_v63 }
 0x1dd   : > { %1899 = vmatprep.subr.bf16.mxu1 %v2445_v0 }
 0x27f   : > { %v719_v29 = vpop.f32.mrf.mxu1 }
 0x280   : > { %v720_v30 = vadd.f32 %v1664_v28, %v719_v29 }
 0x281   : > { %v1837_v31 = vpop.f32.mrf.mxu1 }
 0x282   : > { %v726_v33 = vmax.f32 %v720_v30, 0.0 }
 0x283   : > { %v722_v34 = vpop.f32.mrf.mxu1 }
 0x284   : > { %v723_v35 = vadd.f32 %v1664_v28, %v722_v34  ;;  %v735_v36 = vmul.f32 %v1673_v32, %v726_v33  ;;  %v2841_v28 = vand.u32 127, %v1000_v27 }
 0x285   : > { %v1838_v37 = vpop.f32.mrf.mxu1 }
 0x286   : > { %v727_v38 = vmax.f32 %v723_v35, 0.0  ;;  %737 = vadd.xlane.f32.xlu0 %v735_v36  ;;  %vm1002_vm1 = vcmp.lt.s32.totalorder %v2841_v28, 64  ;;  %vm1323_vm2 = vcmp.lt.s32.totalorder %v2841_v28, 16  ;;  %v1716_v28 = vld [vmem:[#allocation5 + $0xb] ss:$0 sm:$0xff] }
 0x288   : > { %v736_v39 = vmul.f32 %v1673_v32, %v727_v38 }
 0x28a   : > { %739 = vadd.xlane.f32.xlu0 %v736_v39  ;;  %v2066_v39 = vld [vmem:[#allocation10 + $0x38] sm:$0xff]  }
 0x30f   : > { %v738_v42 = vpop.xlane.xlu0 %737 }
 0x310   : > { %v741_v43 = vsub.f32 %v726_v33, %v738_v42  ;;  %v2069_v42 = vld [vmem:[#allocation10 + $0x20] sm:$0xff]  }
 0x312   : > { %v743_v44 = vmul.f32 %v741_v43, %v741_v43 }
 0x313   : > { %v740_v45 = vpop.xlane.xlu0 %739 }
 0x314   : > { %v742_v46 = vsub.f32 %v727_v38, %v740_v45  ;;  %v745_v47 = vmul.f32 %v1673_v32, %v743_v44  ;;  %v2071_v44 = vld [vmem:[#allocation10 + $0x10] sm:$0xff]   ;;  %v2072_v45 = vld [vmem:[#allocation10 + $0x8] sm:$0xff]  }
 0x316   : > { %v744_v48 = vmul.f32 %v742_v46, %v742_v46  ;;  %747 = vadd.xlane.f32.xlu1 %v745_v47 }
 0x318   : > { %v746_v49 = vmul.f32 %v1673_v32, %v744_v48 }
 0x31a   : > { %749 = vadd.xlane.f32.xlu1 %v746_v49 }
 0x39f   : > { %v748_v1 = vpop.xlane.xlu1 %747 }
 0x3a0   : > { %v751_v2 = vadd.f32 1e-05, %v748_v1 }
 0x3a2   : > { %2082 = vrsqrt.f32 %v751_v2 }
 0x3a3   : > { %v750_v3 = vpop.xlane.xlu1 %749 }
 0x3a4   : > { %v752_v4 = vadd.f32 1e-05, %v750_v3 }
 0x3a6   : > { %2084 = vrsqrt.f32 %v752_v4 }
 0x3af   : > { %v2083_v5 = vpop.eup %2082 }
 0x3b0   : > { %v755_v6 = vmul.f32 %v2083_v5, %v741_v43  ;;  %v2070_v43 = vld [vmem:[#allocation10 + $0x18] sm:$0xff]  }
 0x3b2   : > { %v761_v10 = vmul.f32 %v1674_v7, %v755_v6 }
 0x3b3   : > { %v2085_v8 = vpop.eup %2084 }
 0x3b4   : > { %v756_v9 = vmul.f32 %v2085_v8, %v742_v46  ;;  %v767_v13 = vadd.f32 %v1675_v11, %v761_v10  ;;  %v2073_v46 = vld [vmem:[#allocation10] sm:$0xff]  }
 0x3b6   : > { %v762_v12 = vmul.f32 %v1674_v7, %v756_v9 }
 0x3b8   : > { %v768_v14 = vadd.f32 %v1675_v11, %v762_v12  ;;  %v1696_v11 = vld [vmem:[#allocation5 + $0x7] ss:$0 sm:$0xff] }
 0x3ba   : > { %v769_v15 = vpack.c.bf16 %v768_v14, %v767_v13 }
 0x3bc   : > { %1856 = vmatmul.mubr.bf16.vlgmr.msra.gmra.mxu0 %v769_v15  ;;  %1876 = vmatmul.mubr.bf16.vlgmr.msra.gmra.mxu1 %v769_v15 }
 0x3bd   : > { %1895 = vmatprep.mubr.msk.bf16.mxu0 %vm2446_vm0, %v2445_v0  ;;  %1915 = vmatprep.mubr.msk.bf16.mxu1 %vm2446_vm0, %v2445_v0 }
 0x3be   : > { %1880 = vmatpush3.bf16.msra.mxu0 %v2066_v39 }
 0x3bf   : > { %1881 = vmatprep.subr.bf16.mxu0 %v2445_v0 }
 0x3c2   : > { %1882 = vmatpush3.bf16.msra.mxu0 %v2067_v40 }
 0x3c3   : > { %1883 = vmatprep.subr.bf16.mxu0 %v2445_v0 }
 0x3c6   : > { %1884 = vmatpush3.bf16.msra.mxu0 %v2068_v41 }
 0x3c7   : > { %1885 = vmatprep.subr.bf16.mxu0 %v2445_v0 }
 0x3ca   : > { %1886 = vmatpush3.bf16.msra.mxu0 %v2069_v42 }
 0x3cb   : > { %1887 = vmatprep.subr.bf16.mxu0 %v2445_v0 }
 0x3ce   : > { %1888 = vmatpush3.bf16.msra.mxu0 %v2070_v43 }
 0x3cf   : > { %1889 = vmatprep.subr.bf16.mxu0 %v2445_v0 }
 0x3d2   : > { %1890 = vmatpush3.bf16.msra.mxu0 %v2071_v44 }
 0x3d3   : > { %1891 = vmatprep.subr.bf16.mxu0 %v2445_v0 }
 0x3d6   : > { %1892 = vmatpush3.bf16.msra.mxu0 %v2072_v45 }
 0x3d7   : > { %1893 = vmatprep.subr.bf16.mxu0 %v2445_v0 }
 0x3da   : > { %1894 = vmatpush3.bf16.msra.mxu0 %v2073_v46  ;;  %v1705_v46 = vld [vmem:[#allocation5 + $0x8] ss:$0 sm:$0xff] }
 0x47c   : > { %v2837_v17 = vpop.f32.mrf.mxu0  ;;  %v983_v18 = vpop.f32.mrf.mxu1 }
 0x47d   : > { %v984_v19 = vadd.f32 %v1685_v16, %v983_v18 }
 0x47e   : > { %v1857_v20 = vpop.f32.mrf.mxu0  ;;  %v1877_v21 = vpop.f32.mrf.mxu1 }
 0x47f   : > { %992 = vadd.xlane.f32.xlu0 %v984_v19 }
 0x480   : > { %v2839_v22 = vpop.f32.mrf.mxu0  ;;  %v986_v23 = vpop.f32.mrf.mxu1 }
 0x481   : > { %v987_v24 = vadd.f32 %v1685_v16, %v986_v23 }
 0x482   : > { %v1858_v25 = vpop.f32.mrf.mxu0  ;;  %v1878_v26 = vpop.f32.mrf.mxu1 }
 0x483   : > { %994 = vadd.xlane.f32.xlu1 %v987_v24 }
 0x508   : > { %v993_v29 = vpop.xlane.xlu0 %992 }
 0x509   : > { %v996_v30 = vmul.f32 0.015625, %v993_v29 }
 0x50b   : > { %v998_v31 = vsub.f32 %v984_v19, %v996_v30 }
 0x50c   : > { %v995_v32 = vpop.xlane.xlu1 %994 }
 0x50d   : > { %v997_v33 = vmul.f32 0.015625, %v995_v32  ;;  %v1005_v34 = vsel %vm1002_vm1, %v998_v31, 0.0  ;;  %v2074_v31 = vld [vmem:[#allocation11 + $0x38] sm:$0xff]   ;;  %v2075_v32 = vld [vmem:[#allocation11 + $0x30] sm:$0xff]  }
 0x50e   : > { %v1007_v35 = vmul.f32 %v1005_v34, %v1005_v34  ;;  %1900 = vmatpush3.bf16.msra.mxu1 %v2074_v31 }
 0x50f   : > { %v999_v36 = vsub.f32 %v987_v24, %v997_v33  ;;  %1901 = vmatprep.subr.bf16.mxu1 %v2445_v0  ;;  %v2076_v33 = vld [vmem:[#allocation11 + $0x28] sm:$0xff]  }
 0x510   : > { %1009 = vadd.xlane.f32.xlu0 %v1007_v35  ;;  %v2078_v35 = vld [vmem:[#allocation11 + $0x18] sm:$0xff]  }
 0x511   : > { %v1006_v37 = vsel %vm1002_vm1, %v999_v36, 0.0  ;;  %v2079_v36 = vld [vmem:[#allocation11 + $0x10] sm:$0xff]  }
 0x512   : > { %v1008_v38 = vmul.f32 %v1006_v37, %v1006_v37  ;;  %1902 = vmatpush3.bf16.msra.mxu1 %v2075_v32 }
 0x513   : > { %1903 = vmatprep.subr.bf16.mxu1 %v2445_v0 }
 0x514   : > { %1011 = vadd.xlane.f32.xlu1 %v1008_v38  ;;  %v2081_v38 = vld [vmem:[#allocation11] sm:$0xff]  }
 0x516   : > { %1904 = vmatpush3.bf16.msra.mxu1 %v2076_v33  ;;  %v1676_v33 = vld [vmem:[#allocation5 + $0x3] ss:$0 sm:$0xff] }
 0x517   : > { %1905 = vmatprep.subr.bf16.mxu1 %v2445_v0 }
 0x599   : > { %v1010_v47 = vpop.xlane.xlu0 %1009 }
 0x59a   : > { %v1013_v48 = vmul.f32 0.015625, %v1010_v47 }
 0x59c   : > { %v1015_v49 = vadd.f32 1e-05, %v1013_v48  ;;  %v1706_v48 = vld [vmem:[#allocation5 + $0x9] ss:$0 sm:$0xff] }
 0x59d   : > { %v1012_v50 = vpop.xlane.xlu1 %1011 }
 0x59e   : > { %2086 = vrsqrt.f32 %v1015_v49  ;;  %v1014_v51 = vmul.f32 0.015625, %v1012_v50 }
 0x5a0   : > { %v1016_v52 = vadd.f32 1e-05, %v1014_v51 }
 0x5a2   : > { %2088 = vrsqrt.f32 %v1016_v52 }
 0x5ab   : > { %v2087_v53 = vpop.eup %2086 }
 0x5ac   : > { %v1019_v55 = vmul.f32 %v2087_v53, %v1005_v34  ;;  %v2077_v34 = vld [vmem:[#allocation11 + $0x20] sm:$0xff]  }
 0x5ad   : > { %1906 = vmatpush3.bf16.msra.mxu1 %v2077_v34  ;;  %v1718_v34 = vld [vmem:[#allocation5 + $0xd] ss:$0 sm:$0xff] }
 0x5ae   : > { %v1025_v57 = vmul.f32 %v1694_v54, %v1019_v55  ;;  %1907 = vmatprep.subr.bf16.mxu1 %v2445_v0 }
 0x5af   : > { %v2089_v58 = vpop.eup %2088 }
 0x5b0   : > { %v1020_v59 = vmul.f32 %v2089_v58, %v1006_v37  ;;  %v1031_v60 = vadd.f32 %v1695_v56, %v1025_v57  ;;  %v2080_v37 = vld [vmem:[#allocation11 + $0x8] sm:$0xff]  }
 0x5b1   : > { %1908 = vmatpush3.bf16.msra.mxu1 %v2078_v35 }
 0x5b2   : > { %v1026_v61 = vmul.f32 %v1694_v54, %v1020_v59  ;;  %v1035_v62 = vmul.f32 0.70710677, %v1031_v60  ;;  %v1033_v5 = vmul.f32 0.5, %v1031_v60  ;;  %1909 = vmatprep.subr.bf16.mxu1 %v2445_v0 }
 0x5b4   : > { %v1032_v63 = vadd.f32 %v1695_v56, %v1026_v61  ;;  %2090 = verf.f32 %v1035_v62 }
 0x5b5   : > { %1910 = vmatpush3.bf16.msra.mxu1 %v2079_v36 }
 0x5b6   : > { %v1036_v1 = vmul.f32 0.70710677, %v1032_v63  ;;  %v1034_v6 = vmul.f32 0.5, %v1032_v63  ;;  %1911 = vmatprep.subr.bf16.mxu1 %v2445_v0 }
 0x5b8   : > { %2092 = verf.f32 %v1036_v1 }
 0x5b9   : > { %1912 = vmatpush3.bf16.msra.mxu1 %v2080_v37  ;;  %v874_v37 = vadd.f32 %v1676_v33, %v2837_v17 }
 0x5ba   : > { %1913 = vmatprep.subr.bf16.mxu1 %v2445_v0 }
 0x5bd   : > { %1914 = vmatpush3.bf16.msra.mxu1 %v2081_v38 }
 0x5c1   : > { %v2091_v2 = vpop.eup %2090 }
 0x5c2   : > { %v1039_v3 = vadd.f32 1.0, %v2091_v2  ;;  %v1707_v2 = vld [vmem:[#allocation5 + $0xa] ss:$0 sm:$0xff] }
 0x5c4   : > { %v1041_v8 = vmul.f32 %v1039_v3, %v1033_v5 }
 0x5c5   : > { %v2093_v4 = vpop.eup %2092 }
 0x5c6   : > { %v1040_v7 = vadd.f32 1.0, %v2093_v4 }
 0x5c8   : > { %v1042_v9 = vmul.f32 %v1040_v7, %v1034_v6 }
 0x5ca   : > { %v1043_v10 = vpack.c.bf16 %v1042_v9, %v1041_v8 }
 0x5cc   : > { %1896 = vmatmul.mubr.bf16.vlgmr.msra.gmra.mxu0 %v1043_v10 }
 0x68c   : > { %v1147_v12 = vpop.f32.mrf.mxu0 }
 0x68d   : > { %v1148_v13 = vadd.f32 %v1696_v11, %v1147_v12 }
 0x68e   : > { %v1897_v14 = vpop.f32.mrf.mxu0 }
 0x68f   : > { %1156 = vadd.xlane.f32.xlu0 %v1148_v13 }
 0x690   : > { %v1150_v15 = vpop.f32.mrf.mxu0 }
 0x691   : > { %v1151_v16 = vadd.f32 %v1696_v11, %v1150_v15 }
 0x692   : > { %v1898_v18 = vpop.f32.mrf.mxu0 }
 0x693   : > { %1158 = vadd.xlane.f32.xlu1 %v1151_v16 }
 0x718   : > { %v1157_v19 = vpop.xlane.xlu0 %1156 }
 0x719   : > { %v1160_v20 = vmul.f32 0.015625, %v1157_v19 }
 0x71b   : > { %v1162_v21 = vsub.f32 %v1148_v13, %v1160_v20 }
 0x71c   : > { %v1159_v23 = vpop.xlane.xlu1 %1158 }
 0x71d   : > { %v1161_v24 = vmul.f32 0.015625, %v1159_v23  ;;  %v1164_v25 = vsel %vm1002_vm1, %v1162_v21, 0.0 }
 0x71e   : > { %v1166_v26 = vmul.f32 %v1164_v25, %v1164_v25 }
 0x71f   : > { %v1163_v27 = vsub.f32 %v1151_v16, %v1161_v24 }
 0x720   : > { %1168 = vadd.xlane.f32.xlu0 %v1166_v26 }
 0x721   : > { %v1165_v29 = vsel %vm1002_vm1, %v1163_v27, 0.0 }
 0x722   : > { %v1167_v30 = vmul.f32 %v1165_v29, %v1165_v29 }
 0x724   : > { %1170 = vadd.xlane.f32.xlu1 %v1167_v30  ;;  %v1717_v30 = vld [vmem:[#allocation5 + $0xc] ss:$0 sm:$0xff] }
 0x7a9   : > { %v1169_v39 = vpop.xlane.xlu0 %1168 }
 0x7aa   : > { %v1172_v40 = vmul.f32 0.015625, %v1169_v39 }
 0x7ac   : > { %v1174_v41 = vadd.f32 1e-05, %v1172_v40 }
 0x7ad   : > { %v1171_v42 = vpop.xlane.xlu1 %1170 }
 0x7ae   : > { %2094 = vrsqrt.f32 %v1174_v41  ;;  %v1173_v43 = vmul.f32 0.015625, %v1171_v42  ;;  %v877_v42 = vadd.f32 %v1676_v33, %v2839_v22 }
 0x7b0   : > { %v1175_v44 = vadd.f32 1e-05, %v1173_v43 }
 0x7b2   : > { %2096 = vrsqrt.f32 %v1175_v44 }
 0x7bb   : > { %v2095_v45 = vpop.eup %2094 }
 0x7bc   : > { %v1178_v47 = vmul.f32 %v2095_v45, %v1164_v25 }
 0x7be   : > { %v1184_v49 = vmul.f32 %v1705_v46, %v1178_v47 }
 0x7bf   : > { %v2097_v50 = vpop.eup %2096 }
 0x7c0   : > { %v1179_v51 = vmul.f32 %v2097_v50, %v1165_v29  ;;  %v1190_v52 = vadd.f32 %v1706_v48, %v1184_v49 }
 0x7c2   : > { %v1185_v53 = vmul.f32 %v1705_v46, %v1179_v51  ;;  %v1194_v54 = vmul.f32 0.70710677, %v1190_v52  ;;  %v1192_v59 = vmul.f32 0.5, %v1190_v52 }
 0x7c4   : > { %v1191_v0 = vadd.f32 %v1706_v48, %v1185_v53  ;;  %2098 = verf.f32 %v1194_v54 }
 0x7c6   : > { %v1195_v55 = vmul.f32 0.70710677, %v1191_v0  ;;  %v1193_v60 = vmul.f32 0.5, %v1191_v0 }
 0x7c8   : > { %2100 = verf.f32 %v1195_v55 }
 0x7d1   : > { %v2099_v56 = vpop.eup %2098 }
 0x7d2   : > { %v1198_v57 = vadd.f32 1.0, %v2099_v56 }
 0x7d4   : > { %v1200_v62 = vmul.f32 %v1198_v57, %v1192_v59 }
 0x7d5   : > { %v2101_v58 = vpop.eup %2100 }
 0x7d6   : > { %v1199_v61 = vadd.f32 1.0, %v2101_v58 }
 0x7d8   : > { %v1201_v63 = vmul.f32 %v1199_v61, %v1193_v60 }
 0x7da   : > { %v1202_v1 = vpack.c.bf16 %v1201_v63, %v1200_v62 }
 0x7dc   : > { %1916 = vmatmul.mubr.bf16.vlgmr.msra.gmra.mxu1 %v1202_v1 }
 0x89c   : > { %v1306_v3 = vpop.f32.mrf.mxu1 }
 0x89d   : > { %v1307_v4 = vadd.f32 %v1707_v2, %v1306_v3 }
 0x89e   : > { %v1917_v5 = vpop.f32.mrf.mxu1 }
 0x89f   : > { %1315 = vadd.xlane.f32.xlu0 %v1307_v4 }
 0x8a0   : > { %v1309_v6 = vpop.f32.mrf.mxu1 }
 0x8a1   : > { %v1310_v7 = vadd.f32 %v1707_v2, %v1309_v6 }
 0x8a2   : > { %v1918_v8 = vpop.f32.mrf.mxu1 }
 0x8a3   : > { %1317 = vadd.xlane.f32.xlu1 %v1310_v7 }
 0x928   : > { %v1316_v9 = vpop.xlane.xlu0 %1315 }
 0x929   : > { %v1319_v10 = vmul.f32 0.0625, %v1316_v9 }
 0x92b   : > { %v1321_v11 = vsub.f32 %v1307_v4, %v1319_v10 }
 0x92c   : > { %v1318_v12 = vpop.xlane.xlu1 %1317 }
 0x92d   : > { %v1320_v13 = vmul.f32 0.0625, %v1318_v12  ;;  %v1326_v14 = vsel %vm1323_vm2, %v1321_v11, 0.0 }
 0x92e   : > { %v1328_v15 = vmul.f32 %v1326_v14, %v1326_v14 }
 0x92f   : > { %v1322_v16 = vsub.f32 %v1310_v7, %v1320_v13 }
 0x930   : > { %1330 = vadd.xlane.f32.xlu0 %v1328_v15 }
 0x931   : > { %v1327_v18 = vsel %vm1323_vm2, %v1322_v16, 0.0 }
 0x932   : > { %v1329_v19 = vmul.f32 %v1327_v18, %v1327_v18 }
 0x934   : > { %1332 = vadd.xlane.f32.xlu1 %v1329_v19 }
 0x9b9   : > { %v1331_v20 = vpop.xlane.xlu0 %1330 }
 0x9ba   : > { %v1334_v21 = vmul.f32 0.0625, %v1331_v20 }
 0x9bc   : > { %v1336_v23 = vadd.f32 1e-05, %v1334_v21 }
 0x9bd   : > { %v1333_v24 = vpop.xlane.xlu1 %1332 }
 0x9be   : > { %2102 = vrsqrt.f32 %v1336_v23  ;;  %v1335_v25 = vmul.f32 0.0625, %v1333_v24 }
 0x9c0   : > { %v1337_v26 = vadd.f32 1e-05, %v1335_v25 }
 0x9c2   : > { %2104 = vrsqrt.f32 %v1337_v26 }
 0x9cb   : > { %v2103_v27 = vpop.eup %2102 }
 0x9cc   : > { %v1340_v29 = vmul.f32 %v2103_v27, %v1326_v14 }
 0x9ce   : > { %v1346_v31 = vmul.f32 %v1716_v28, %v1340_v29 }
 0x9cf   : > { %v2105_v32 = vpop.eup %2104 }
 0x9d0   : > { %v1352_v35 = vadd.f32 %v1717_v30, %v1346_v31  ;;  %v1341_v36 = vmul.f32 %v2105_v32, %v1327_v18 }
 0x9d2   : > { %v1359_v38 = vmul.f32 %v1718_v34, %v1352_v35  ;;  %v1347_v39 = vmul.f32 %v1716_v28, %v1341_v36 }
 0x9d4   : > { %v1361_v40 = vadd.f32 %v1359_v38, %v874_v37  ;;  %v1353_v41 = vadd.f32 %v1717_v30, %v1347_v39 }
 0x9d6   : > { %v1363_v43 = vmul.f32 %v1361_v40, %v1361_v40  ;;  %v1360_v44 = vmul.f32 %v1718_v34, %v1353_v41 }
 0x9d8   : > { %1365 = vadd.xlane.f32.xlu0 %v1363_v43  ;;  %v1362_v45 = vadd.f32 %v1360_v44, %v877_v42 }
 0x9da   : > { %v1364_v46 = vmul.f32 %v1362_v45, %v1362_v45 }
 0x9dc   : > { %1367 = vadd.xlane.f32.xlu1 %v1364_v46 }
 0xa61   : > { %v1366_v47 = vpop.xlane.xlu0 %1365 }
 0xa62   : > { %2106 = vrsqrt.f32 %v1366_v47  ;;  %vm1371_vm3 = vcmp.eq.f32.partialorder %v1366_v47, inf  ;;  %v1374_v17 = vand.u32 2147483648, %v1366_v47  ;;  %vm1373_vm4 = vcmp.eq.f32.partialorder %v1366_v47, 0.0 }
 0xa65   : > { %v1368_v48 = vpop.xlane.xlu1 %1367 }
 0xa66   : > { %2108 = vrsqrt.f32 %v1368_v48  ;;  %vm1378_vm5 = vcmp.eq.f32.partialorder %v1368_v48, inf  ;;  %v1381_v0 = vand.u32 2147483648, %v1368_v48  ;;  %vm1380_vm6 = vcmp.eq.f32.partialorder %v1368_v48, 0.0 }
 0xa6f   : > { %v2107_v49 = vpop.eup %2106 }
 0xa70   : > { %v1370_v50 = vmul.f32 %v2107_v49, %v1366_v47 }
 0xa72   : > { %v1372_v51 = vsel %vm1371_vm3, %v1366_v47, %v1370_v50 }
 0xa73   : > { %v2109_v52 = vpop.eup %2108  ;;  %v1375_v53 = vsel %vm1373_vm4, %v1374_v17, %v1372_v51 }
 0xa74   : > { %v1383_v22 = vmax.f32 %v1375_v53, 1e-12  ;;  %v1377_v54 = vmul.f32 %v2109_v52, %v1368_v48 }
 0xa76   : > { %2110 = vrcp.f32 %v1383_v22  ;;  %v1379_v55 = vsel %vm1378_vm5, %v1368_v48, %v1377_v54 }
 0xa77   : > { %v1382_v56 = vsel %vm1380_vm6, %v1381_v0, %v1379_v55 }
 0xa78   : > { %v1384_v57 = vmax.f32 %v1382_v56, 1e-12 }
 0xa7a   : > { %2112 = vrcp.f32 %v1384_v57 }
 0xa83   : > { %v2111_v58 = vpop.eup %2110 }
 0xa84   : > { %v1386_v59 = vmul.f32 %v2111_v58, %v1361_v40 }
 0xa86   : > { %1389 = vst [vmem:[%s482_s16] sm:$0xff] %v1386_v59 }
 0xa87   : > { %v2113_v60 = vpop.eup %2112 }
 0xa88   : > { %v1388_v61 = vmul.f32 %v2113_v60, %v1362_v45 }
 0xa8a   : > { %1390 = vst [vmem:[%s482_s16 + $0x8] sm:$0xff] %v1388_v61  ;;  %v1743_v62 = vpack.c.bf16 %v1388_v61, %v1386_v59 }
 0xa8b   : > { %2323 = shalt.err (!%p2320_p5)
}
 0xa8c   : > { %s2324_s16 = scalar_lea.hbm %s2875_s24, 256  ;;  %s2328_s12 = scalar_lea.hbm %s3000_s21, 512 }
 0xa8d   : > { %p2325_p8 = scmp.ne.s32.totalorder %s2875_s24, %s2324_s16  ;;  %p2329_p13 = scmp.lt.s32.totalorder %s2875_s24, %s3000_s21 }
 0xa8e   : > { %p2330_p4 = scmp.lt.s32.totalorder %s2328_s12, %s2324_s16 }
 0xa8f   : > { %p2326_p12 = pnand %p2325_p8, %p2738_p0 }
 0xa90   : > { %p2331_p6 = por %p2330_p4, %p2329_p13 }
 0xa91   : > { %p2327_p11 = pneg %p2326_p12 }
 0xa93   : > { %p2332_p7 = pnand %p2331_p6, %p2327_p11 }
 0xa95   : > { %2335 = shalt.err (!%p2332_p7)
}
 0xa96   : > { %s2448_s26 = smov 128   ;;  %s2449_s3 = smov 8   ;;  %1744 = vst [vmem:[%s2880_s17] sm:$0xff] %v1743_v62  }
 0xa97   : > { %1933 = dma.vmem_to_hbm [thread:$0]  (%p2738_p0), %s2883_s11, 256, %s2875_s24, %s1402_s30, %s2448_s26, %s2448_s26, %s2449_s3  }
 0xa98   : > { %s1407_s13 = scalar_lea.sflag [#allocation16], %s2766_s22  ;;  %s2336_s27 = scalar_lea.vmem %s2890_s1, 128 }
 0xa99   : > { %p2337_p10 = scmp.ne.s32.totalorder %s2890_s1, %s2336_s27  ;;  %s2450_s16 = smov [#allocation15]  }
 0xa9a   : > { %s2340_s8 = sshll.u32 %s2450_s16, 4  ;;  %s2341_s8 = int_to_ptr.vmem [resolvable:$false] %s2340_s8 }
 0xa9b   : > { %p2338_p9 = pnand %p2337_p10, %p2738_p0  ;;  %s2342_s20 = scalar_lea.vmem %s2341_s8, 256 }
 0xa9c   : > { %p2343_p2 = scmp.lt.s32.totalorder %s2890_s1, %s2341_s8  ;;  %p2344_p3 = scmp.lt.s32.totalorder %s2342_s20, %s2336_s27 }
 0xa9d   : > { %p2339_p1 = pneg %p2338_p9 }
 0xa9e   : > { %p2345_p5 = por %p2344_p3, %p2343_p2 }
 0xaa0   : > { %p2346_p8 = pnand %p2345_p5, %p2339_p1 }
 0xaa2   : > { %2349 = shalt.err (!%p2346_p8)
}
 0xaa3   : > { %s2350_s11 = scalar_lea.hbm %s2888_s23, 128  ;;  %s2354_s30 = scalar_lea.hbm %s3001_s7, 256 }
 0xaa4   : > { %p2351_p12 = scmp.ne.s32.totalorder %s2888_s23, %s2350_s11  ;;  %p2355_p4 = scmp.lt.s32.totalorder %s2888_s23, %s3001_s7 }
 0xaa5   : > { %p2356_p6 = scmp.lt.s32.totalorder %s2354_s30, %s2350_s11 }
 0xaa6   : > { %p2352_p11 = pnand %p2351_p12, %p2738_p0 }
 0xaa7   : > { %p2357_p7 = por %p2356_p6, %p2355_p4 }
 0xaa8   : > { %p2353_p13 = pneg %p2352_p11 }
 0xaaa   : > { %p2358_p10 = pnand %p2357_p7, %p2353_p13 }
 0xaac   : > { %2361 = shalt.err (!%p2358_p10)
}
 0xaad   : > { %s2451_s18 = smov 64   ;;  %s2452_s26 = smov 4  }
 0xaae   : > { %1934 = dma.vmem_to_hbm [thread:$0]  (%p2738_p0), %s2890_s1, 128, %s2888_s23, %s1407_s13, %s2451_s18, %s2451_s18, %s2452_s26  }
 0xaaf PF: > { %s3002_s3 = sld [smem:[#allocation23_spill]]  ;;  %p3005_p1 = scmp.ge.s32.totalorder %s2432_s10, 2 }
 0xab0   : > { %s3003_s27 = sld [smem:[#allocation24_spill]] }
 0xab5   : > { %s1455_s16 = sand.u32 1, %s3002_s3  }
 0xab6   : > { %p3004_p9 = scmp.ne.s32.totalorder %s3003_s27, 0  ;;  %s1456_s8 = scalar_lea.sflag [#allocation4], %s1455_s16 }
 0xab8   : > { %p1961_p2 = pnand %p3005_p1, %p3004_p9 }
 0xaba   : > { %p1962_p3 = pneg %p1961_p2 }
 0xabc   : > { %2403 = dma.done.wait (%p1962_p3), %s1456_s8, 256  }
 0xabd   : > { %2405 = vsyncadd (%p1962_p3), %s1456_s8, 4294967040  ;;  %s1465_s20 = scalar_lea.sflag [#allocation16], %s1455_s16 }
 0xabe   : > { %2407 = dma.done.wait (%p1962_p3), %s1465_s20, 128  }
 0xabf   : > { %2409 = vsyncadd (%p1962_p3), %s1465_s20, 4294967168  ;;  %s31_s10 = sadd.s32 1, %s2432_s10   ;;  %s3006_s27 = smov %s2416_s28 }
 0xac0   : > { %p28_p5 = scmp.ge.s32.totalorder %s31_s10, 4   ;;  %s3007_s28 = smov %s2420_s29 }
 0xac1   : > { %s3008_s29 = smov %s2745_s14  ;;  %s3009_s30 = smov %s2428_s9 }
 0xac2   : > { %s3010_s9 = smov %s3012_s25  ;;  %30 = sbr.rel (!%p28_p5) target bundleno = 16 (0x10), region = 141 }
 0xac7   :  { %1470 = vsyncpa [#allocation3], 1 }
 0xac8   :  { %1472 = vsyncpa [#allocation3 + $0x1], 1 }
 0xac9   :  { %1473 = vsyncpa [#allocation6], 1 }
 0xaca   :  { %1474 = vsyncpa [#allocation9], 1 }
 0xacb   :  { %1475 = vsyncpa [#allocation12], 1 }
 0xacc   :  { %1476 = vsyncpa [#allocation4], 1 }
 0xacd   :  { %1478 = vsyncpa [#allocation4 + $0x1], 1 }
 0xace   :  { %1479 = vsyncpa [#allocation16], 1 }
 0xacf   :  { %1481 = vsyncpa [#allocation16 + $0x1], 1 }

</bundles_post_ra>
